<compile_context>
chip_gen: v7x
topology: tpu7x:2x2x1
jax: 0.10.0
libtpu: 0.0.40
codegen_flags: <defaults>
</compile_context>

<pallas_src>
import numpy as np

import jax
import jax.numpy as jnp
from jax.experimental import pallas as pl
from jax.experimental.pallas import tpu as pltpu


# ---------------------------------------------------------------------------
# Host-side (numpy) construction of per-layer dense operators.
# Activations are (N, C*H*W) row vectors, feature index = c*(H*W) + h*W + w.
# Every layer becomes   y = x @ A + b.
# ---------------------------------------------------------------------------
def _conv_selectors(H, W, k, stride, pad):
    """Per-tap selection matrices S_t, each (H*W, OH*OW)."""
    OH = (H + 2 * pad - k) // stride + 1
    OW = (W + 2 * pad - k) // stride + 1
    sels = []
    for dy in range(k):
        for dx in range(k):
            Sh = np.zeros((H, OH), np.float32)
            for oh in range(OH):
                ih = stride * oh - pad + dy
                if 0 <= ih < H:
                    Sh[ih, oh] = 1.0
            Sw = np.zeros((W, OW), np.float32)
            for ow in range(OW):
                iw = stride * ow - pad + dx
                if 0 <= iw < W:
                    Sw[iw, ow] = 1.0
            sels.append(np.kron(Sh, Sw))          # (H*W, OH*OW)
    return sels, OH, OW


def _convT_selectors(H, W, k, stride, pad):
    """Per-tap scatter matrices for ConvTranspose2d, each (H*W, OH*OW)."""
    OH = (H - 1) * stride - 2 * pad + k
    OW = (W - 1) * stride - 2 * pad + k
    sels = []
    for kh in range(k):
        for kw in range(k):
            Sh = np.zeros((H, OH), np.float32)
            for ih in range(H):
                oh = stride * ih - pad + kh
                if 0 <= oh < OH:
                    Sh[ih, oh] = 1.0
            Sw = np.zeros((W, OW), np.float32)
            for iw in range(W):
                ow = stride * iw - pad + kw
                if 0 <= ow < OW:
                    Sw[iw, ow] = 1.0
            sels.append(np.kron(Sh, Sw))
    return sels, OH, OW


def _upsample2x_op(H, W):
    """Bilinear x2 (align_corners=False) as a (H*W, 4*H*W) right-multiplication op."""
    def w1d(L):
        Lo = 2 * L
        Wm = np.zeros((L, Lo), np.float32)
        for o in range(Lo):
            src = max(0.0, (o + 0.5) * 0.5 - 0.5)
            i0 = min(int(np.floor(src)), L - 1)
            i1 = min(i0 + 1, L - 1)
            f = src - float(i0)
            Wm[i0, o] += 1.0 - f
            Wm[i1, o] += f
        return Wm
    return np.kron(w1d(H), w1d(W)), 2 * H, 2 * W


def _dense_conv_op(wt, H, W, stride, pad=1):
    """Conv2d(wt: (Cout,Cin,k,k)) folded into a dense (Cin*H*W, Cout*OH*OW) operator."""
    cout, cin, k, _ = wt.shape
    sels, OH, OW = _conv_selectors(H, W, k, stride, pad)
    A = np.zeros((cin * H * W, cout * OH * OW), np.float32)
    for t in range(k * k):
        dy, dx = divmod(t, k)
        A += np.kron(wt[:, :, dy, dx].T.astype(np.float32), sels[t])
    return A, OH, OW


def _dense_convT_op(wt, H, W, stride=2, pad=1):
    """ConvTranspose2d(wt: (Cin,Cout,k,k)) folded into (Cin*H*W, Cout*OH*OW)."""
    cin, cout, k, _ = wt.shape
    sels, OH, OW = _convT_selectors(H, W, k, stride, pad)
    A = np.zeros((cin * H * W, cout * OH * OW), np.float32)
    for t in range(k * k):
        kh, kw = divmod(t, k)
        A += np.kron(wt[:, :, kh, kw].astype(np.float32), sels[t])
    return A, OH, OW


# ---------------------------------------------------------------------------
# The fused Pallas kernel: 8 matmuls (bf16 operands, f32 accumulation) with
# f32 bias / PReLU / sigmoid epilogues, all constants VMEM/SMEM resident.
# ---------------------------------------------------------------------------
def _make_kernel(layers_meta, n_bufs):
    """layers_meta: tuple of (buf_idx, row_off, k_in, n_out, n_pad, bias_off, alpha_idx).
    alpha_idx is None only for the final (sigmoid -> output) layer."""

    def kernel(*refs):
        alphas_ref = refs[0]                       # SMEM (n_prelu,) f32
        x_ref = refs[1]                            # VMEM (N, K0)    f32
        bias_ref = refs[2]                         # VMEM (1, TOT)   f32
        op_refs = refs[3:3 + n_bufs]               # VMEM packed bf16 operators
        o_ref = refs[3 + n_bufs]                   # VMEM (N, n_out_final) f32

        x = x_ref[...].astype(jnp.bfloat16)        # (N, K0)
        for buf, roff, k_in, n_out, n_pad, boff, aidx in layers_meta:
            a = op_refs[buf][pl.ds(roff, k_in), :]                    # (K, n_pad) bf16
            y = jnp.dot(x, a, preferred_element_type=jnp.float32)     # (N, n_pad) f32
            y = y + bias_ref[:, pl.ds(boff, n_pad)]                   # f32 epilogue
            if aidx is not None:                   # hidden layer: PReLU (scalar alpha)
                alpha = alphas_ref[aidx]
                y = jnp.where(y >= 0.0, y, alpha * y)
                if n_pad != n_out:
                    y = y[:, :n_out]
                x = y.astype(jnp.bfloat16)
            else:                                  # final layer: sigmoid -> output
                if n_pad != n_out:
                    y = y[:, :n_out]
                o_ref[...] = 1.0 / (1.0 + jnp.exp(-y))

    return kernel


# ---------------------------------------------------------------------------
# Build the fused forward pass for a fixed (N, H, W)
# ---------------------------------------------------------------------------
def build_unet(params, N, H, W):
    f32 = np.float32

    def to_np(a):
        return np.asarray(jax.device_get(a), f32)

    ops, biases, alphas, alpha_idx = [], [], [], []
    h, w_sp = H, W

    # encoder: 4x Conv2d(k=3, stride=2, pad=1) + PReLU
    for name in ("enc1", "enc2", "enc3", "enc4"):
        wt, b, a = params[name]
        A, oh, ow = _dense_conv_op(to_np(wt), h, w_sp, stride=2, pad=1)
        ops.append(A)
        biases.append(np.repeat(to_np(b), oh * ow))
        alpha_idx.append(len(alphas)); alphas.append(float(np.asarray(a)))
        h, w_sp = oh, ow

    # decoder: 3x (bilinear x2 upsample + Conv2d(k=3, stride=1, pad=1)) + PReLU
    for name in ("dec1", "dec2", "dec3"):
        wt, b, a = params[name]
        wt_np = to_np(wt)
        cin = wt_np.shape[1]
        U, uh, uw = _upsample2x_op(h, w_sp)                   # (h*w, uh*uw)
        A_conv, oh, ow = _dense_conv_op(wt_np, uh, uw, stride=1, pad=1)
        A = np.kron(np.eye(cin, dtype=f32), U) @ A_conv       # upsample folded in
        ops.append(A.astype(f32))
        biases.append(np.repeat(to_np(b), oh * ow))
        alpha_idx.append(len(alphas)); alphas.append(float(np.asarray(a)))
        h, w_sp = oh, ow

    # final: ConvTranspose2d(F, 1, 4, stride=2, pad=1) + Sigmoid
    wt, b = params["dec4"]
    A, oh, ow = _dense_convT_op(to_np(wt), h, w_sp, stride=2, pad=1)
    ops.append(A)
    biases.append(np.repeat(to_np(b), oh * ow))
    alpha_idx.append(None)
    h, w_sp = oh, ow
    assert (h, w_sp) == (H, W), (h, w_sp)

    assert ops[0].shape[0] == params["enc1"][0].shape[1] * H * W
    for i in range(1, len(ops)):
        assert ops[i].shape[0] == ops[i - 1].shape[1], (i, ops[i].shape, ops[i - 1].shape)

    # -------------------- pack constants -------------------------------------
    LANE, SUB = 128, 16                       # bf16 VMEM tile = (16, 128)
    n_layers = len(ops)
    n_out = [a.shape[1] for a in ops]
    n_pad = [-(-n // LANE) * LANE for n in n_out]
    for i in range(n_layers):                 # pad output (lane) dim to 128 multiple
        if n_pad[i] != n_out[i]:
            ops[i] = np.concatenate(
                [ops[i], np.zeros((ops[i].shape[0], n_pad[i] - n_out[i]), f32)], 1)

    groups = {}                               # lane width -> layer indices
    for i in range(n_layers):
        groups.setdefault(ops[i].shape[1], []).append(i)

    loc = [None] * n_layers
    buffers = []
    for buf_idx, width in enumerate(sorted(groups)):
        rows, off = [], 0
        for li in groups[width]:
            k = ops[li].shape[0]
            loc[li] = (buf_idx, off, k)
            rows.append(ops[li]); off += k
            rpad = (-k) % SUB                 # keep row offsets sublane aligned
            if rpad:
                rows.append(np.zeros((rpad, width), f32)); off += rpad
        buffers.append(jnp.asarray(np.concatenate(rows, 0), jnp.bfloat16))

    bias_off, segs, off = [], [], 0
    for i in range(n_layers):
        seg = np.zeros(n_pad[i], f32)
        seg[:n_out[i]] = biases[i]
        bias_off.append(off); segs.append(seg); off += n_pad[i]
    bias_pack = jnp.asarray(np.concatenate(segs)[None, :], jnp.float32)   # (1, TOT)
    alphas_arr = jnp.asarray(np.asarray(alphas, f32))                     # (n_prelu,)

    layers_meta = tuple(
        (loc[i][0], loc[i][1], loc[i][2], n_out[i], n_pad[i], bias_off[i], alpha_idx[i])
        for i in range(n_layers))
    n_bufs = len(buffers)

    call = pl.pallas_call(
        _make_kernel(layers_meta, n_bufs),
        out_shape=jax.ShapeDtypeStruct((N, n_out[-1]), jnp.float32),
        in_specs=[pl.BlockSpec(memory_space=pltpu.SMEM),
                  pl.BlockSpec(memory_space=pltpu.VMEM),
                  pl.BlockSpec(memory_space=pltpu.VMEM)]
                 + [pl.BlockSpec(memory_space=pltpu.VMEM)] * n_bufs,
        out_specs=pl.BlockSpec(memory_space=pltpu.VMEM),
    )

    @jax.jit
    def _forward(x_nchw, alphas_in, bias_in, bufs):
        n, c, hh, ww = x_nchw.shape
        x_flat = x_nchw.reshape(n, c * hh * ww)    # (N, C*H*W), contiguous -> free
        y = call(alphas_in, x_flat, bias_in, *bufs)
        return y.reshape(n, 1, hh, ww)

    def forward(x_nchw):
        return _forward(x_nchw, alphas_arr, bias_pack, tuple(buffers))

    return forward


# ---------------------------------------------------------------------------
# Parameters (deterministic synthetic init, PyTorch weight layouts)
# ---------------------------------------------------------------------------
def init_params(key, n_filters):
    def conv_init(k, cout, cin, ksz):
        k1, k2 = jax.random.split(k)
        fan_in = cin * ksz * ksz
        w = jax.random.normal(k1, (cout, cin, ksz, ksz), jnp.float32) / jnp.sqrt(fan_in)
        b = 0.01 * jax.random.normal(k2, (cout,), jnp.float32)
        return w, b

    keys = jax.random.split(key, 8)
    F = n_filters
    params = {}
    enc_specs = [(3, F), (F, 2 * F), (2 * F, 4 * F), (4 * F, 512)]
    for i, (ci, co) in enumerate(enc_specs):
        w, b = conv_init(keys[i], co, ci, 3)
        params[f"enc{i + 1}"] = (w, b, jnp.full((), 0.25, jnp.float32))   # PReLU init
    dec_specs = [(512, 4 * F), (4 * F, 2 * F), (2 * F, F)]
    for i, (ci, co) in enumerate(dec_specs):
        w, b = conv_init(keys[4 + i], co, ci, 3)
        params[f"dec{i + 1}"] = (w, b, jnp.full((), 0.25, jnp.float32))
    k1, k2 = jax.random.split(keys[7])
    w_t = jax.random.normal(k1, (F, 1, 4, 4), jnp.float32) / jnp.sqrt(F * 16.0)
    b_t = 0.01 * jax.random.normal(k2, (1,), jnp.float32)
    params["dec4"] = (w_t, b_t)
    return params


# ---------------------------------------------------------------------------
# Pure-JAX reference (NCHW semantics identical to the PyTorch module), used
# only as a correctness cross-check in __main__.
# ---------------------------------------------------------------------------
def _ref_conv2d(x, w, b, stride, pad):          # x NHWC, w (Cout,Cin,kh,kw)
    N, H, W, C = x.shape
    cout, cin, kh, kw = w.shape
    xp = jnp.pad(x, ((0, 0), (pad, pad), (pad, pad), (0, 0)))
    OH = (H + 2 * pad - kh) // stride + 1
    OW = (W + 2 * pad - kw) // stride + 1
    slabs = []
    for i in range(kh):
        for j in range(kw):
            slabs.append(xp[:, i:i + stride * (OH - 1) + 1:stride,
                              j:j + stride * (OW - 1) + 1:stride, :])
    patches = jnp.concatenate(slabs, axis=-1).reshape(N * OH * OW, kh * kw * cin)
    wm = jnp.transpose(w, (2, 3, 1, 0)).reshape(kh * kw * cin, cout)
    y = patches @ wm + b
    return y.reshape(N, OH, OW, cout)


def _ref_upsample2x(x):                         # NHWC, bilinear, align_corners=False
    def up_axis(x, axis):
        L = x.shape[axis]
        o = jnp.arange(2 * L, dtype=jnp.float32)
        src = jnp.maximum(0.0, (o + 0.5) * 0.5 - 0.5)
        i0 = jnp.clip(jnp.floor(src).astype(jnp.int32), 0, L - 1)
        i1 = jnp.clip(i0 + 1, 0, L - 1)
        f = src - i0.astype(jnp.float32)
        lo = jnp.take(x, i0, axis=axis)
        hi = jnp.take(x, i1, axis=axis)
        shape = [1] * x.ndim
        shape[axis] = 2 * L
        f = f.reshape(shape)
        return lo * (1.0 - f) + hi * f
    return up_axis(up_axis(x, 1), 2)


def _ref_conv_transpose(x, w_t, b):             # x NHWC, w_t (Cin,Cout,4,4), s=2, p=1
    N, H, W, C = x.shape
    cin, cout, kh, kw = w_t.shape
    xd = jnp.zeros((N, 2 * H - 1, 2 * W - 1, C), x.dtype).at[:, ::2, ::2, :].set(x)
    w_conv = jnp.transpose(w_t[:, :, ::-1, ::-1], (1, 0, 2, 3))
    return _ref_conv2d(xd, w_conv, b, stride=1, pad=kh - 1 - 1)


def unet_reference(x_nchw, params):
    x = jnp.transpose(x_nchw, (0, 2, 3, 1))
    for name in ("enc1", "enc2", "enc3", "enc4"):
        w, b, a = params[name]
        y = _ref_conv2d(x, w, b, 2, 1)
        x = jnp.where(y >= 0, y, a * y)
    for name in ("dec1", "dec2", "dec3"):
        w, b, a = params[name]
        y = _ref_conv2d(_ref_upsample2x(x), w, b, 1, 1)
        x = jnp.where(y >= 0, y, a * y)
    w_t, b_t = params["dec4"]
    x = jax.nn.sigmoid(_ref_conv_transpose(x, w_t, b_t))
    return jnp.transpose(x, (0, 3, 1, 2))


if __name__ == "__main__":
    n_filters = 8
    key = jax.random.PRNGKey(0)
    k_params, k_input = jax.random.split(key)

    params = init_params(k_params, n_filters)

    N, C, H, W = 2, 3, 16, 16
    x = jax.random.normal(k_input, (N, C, H, W), jnp.float32)   # NCHW, like PyTorch

    forward = build_unet(params, N, H, W)
    y = jax.block_until_ready(forward(x))

    assert y.shape == (N, 1, H, W), y.shape
    assert y.dtype == jnp.float32
    assert bool(jnp.all(jnp.isfinite(y)))
    assert bool(jnp.all((y >= 0.0) & (y <= 1.0)))               # sigmoid output range

    # cross-check against a pure-JAX f32 reference; bf16 operator entries + bf16
    # activation casts with f32 accumulation give ~1e-3 error in practice, 2e-2
    # leaves margin (tightened 5x from the previous 1e-1 tolerance).
    y_ref = jax.block_until_ready(unet_reference(x, params))
    assert bool(jnp.max(jnp.abs(y - y_ref)) < 2e-2), float(jnp.max(jnp.abs(y - y_ref)))

    print("KERNEL_OK")
</pallas_src>

<mosaic_0001>
module attributes {stable_mosaic.version = 11 : i64} {
  func.func @kernel(%arg0: memref<7xf32, #tpu.memory_space<smem>>, %arg1: memref<2x768xf32, #tpu.memory_space<vmem>>, %arg2: memref<1x2560xf32, #tpu.memory_space<vmem>>, %arg3: memref<768x128xbf16, #tpu.memory_space<vmem>>, %arg4: memref<1152x256xbf16, #tpu.memory_space<vmem>>, %arg5: memref<1152x512xbf16, #tpu.memory_space<vmem>>, %arg6: memref<2x256xf32, #tpu.memory_space<vmem>>) attributes {dimension_semantics = [], scalar_prefetch = 0 : i64, scratch_operands = 0 : i64, tpu.core_type = #tpu.core_type<tc>} {
    %c0 = arith.constant 0 : index
    %c0_0 = arith.constant 0 : index
    %0 = vector.load %arg1[%c0, %c0_0] : memref<2x768xf32, #tpu.memory_space<vmem>>, vector<2x768xf32>
    %1 = arith.truncf %0 : vector<2x768xf32> to vector<2x768xbf16>
    %c0_1 = arith.constant 0 : index
    %c0_2 = arith.constant 0 : index
    %2 = vector.load %arg5[%c0_1, %c0_2] : memref<1152x512xbf16, #tpu.memory_space<vmem>>, vector<768x512xbf16>
    %cst = arith.constant dense<0.000000e+00> : vector<2x512xf32>
    %3 = tpu.matmul %1, %2, %cst {dimension_numbers = #tpu.dot_dimension_numbers<[1], [0], [0], [1], [0, 0, 1, 1], [], []>} : vector<2x768xbf16>, vector<768x512xbf16>, vector<2x512xf32> -> vector<2x512xf32>
    %c0_3 = arith.constant 0 : index
    %c0_4 = arith.constant 0 : index
    %4 = vector.load %arg2[%c0_3, %c0_4] : memref<1x2560xf32, #tpu.memory_space<vmem>>, vector<1x512xf32>
    %5 = vector.broadcast %4 : vector<1x512xf32> to vector<2x512xf32>
    %6 = arith.addf %3, %5 : vector<2x512xf32>
    %c0_5 = arith.constant 0 : index
    %7 = memref.load %arg0[%c0_5] : memref<7xf32, #tpu.memory_space<smem>>
    %cst_6 = arith.constant 0.000000e+00 : f32
    %8 = vector.broadcast %cst_6 : f32 to vector<2x512xf32>
    %9 = arith.cmpf oge, %6, %8 : vector<2x512xf32>
    %10 = vector.broadcast %7 : f32 to vector<2x512xf32>
    %11 = arith.mulf %10, %6 : vector<2x512xf32>
    %12 = arith.select %9, %6, %11 : vector<2x512xi1>, vector<2x512xf32>
    %13 = arith.truncf %12 : vector<2x512xf32> to vector<2x512xbf16>
    %c0_7 = arith.constant 0 : index
    %c0_8 = arith.constant 0 : index
    %14 = vector.load %arg4[%c0_7, %c0_8] : memref<1152x256xbf16, #tpu.memory_space<vmem>>, vector<512x256xbf16>
    %cst_9 = arith.constant dense<0.000000e+00> : vector<2x256xf32>
    %15 = tpu.matmul %13, %14, %cst_9 {dimension_numbers = #tpu.dot_dimension_numbers<[1], [0], [0], [1], [0, 0, 1, 1], [], []>} : vector<2x512xbf16>, vector<512x256xbf16>, vector<2x256xf32> -> vector<2x256xf32>
    %c0_10 = arith.constant 0 : index
    %c512 = arith.constant 512 : index
    %16 = vector.load %arg2[%c0_10, %c512] : memref<1x2560xf32, #tpu.memory_space<vmem>>, vector<1x256xf32>
    %17 = vector.broadcast %16 : vector<1x256xf32> to vector<2x256xf32>
    %18 = arith.addf %15, %17 : vector<2x256xf32>
    %c1 = arith.constant 1 : index
    %19 = memref.load %arg0[%c1] : memref<7xf32, #tpu.memory_space<smem>>
    %cst_11 = arith.constant 0.000000e+00 : f32
    %20 = vector.broadcast %cst_11 : f32 to vector<2x256xf32>
    %21 = arith.cmpf oge, %18, %20 : vector<2x256xf32>
    %22 = vector.broadcast %19 : f32 to vector<2x256xf32>
    %23 = arith.mulf %22, %18 : vector<2x256xf32>
    %24 = arith.select %21, %18, %23 : vector<2x256xi1>, vector<2x256xf32>
    %25 = arith.truncf %24 : vector<2x256xf32> to vector<2x256xbf16>
    %c0_12 = arith.constant 0 : index
    %c0_13 = arith.constant 0 : index
    %26 = vector.load %arg3[%c0_12, %c0_13] : memref<768x128xbf16, #tpu.memory_space<vmem>>, vector<256x128xbf16>
    %cst_14 = arith.constant dense<0.000000e+00> : vector<2x128xf32>
    %27 = tpu.matmul %25, %26, %cst_14 {dimension_numbers = #tpu.dot_dimension_numbers<[1], [0], [0], [1], [0, 0, 1, 1], [], []>} : vector<2x256xbf16>, vector<256x128xbf16>, vector<2x128xf32> -> vector<2x128xf32>
    %c0_15 = arith.constant 0 : index
    %c768 = arith.constant 768 : index
    %28 = vector.load %arg2[%c0_15, %c768] : memref<1x2560xf32, #tpu.memory_space<vmem>>, vector<1x128xf32>
    %29 = vector.broadcast %28 : vector<1x128xf32> to vector<2x128xf32>
    %30 = arith.addf %27, %29 : vector<2x128xf32>
    %c2 = arith.constant 2 : index
    %31 = memref.load %arg0[%c2] : memref<7xf32, #tpu.memory_space<smem>>
    %cst_16 = arith.constant 0.000000e+00 : f32
    %32 = vector.broadcast %cst_16 : f32 to vector<2x128xf32>
    %33 = arith.cmpf oge, %30, %32 : vector<2x128xf32>
    %34 = vector.broadcast %31 : f32 to vector<2x128xf32>
    %35 = arith.mulf %34, %30 : vector<2x128xf32>
    %36 = arith.select %33, %30, %35 : vector<2x128xi1>, vector<2x128xf32>
    %37 = arith.truncf %36 : vector<2x128xf32> to vector<2x128xbf16>
    %c768_17 = arith.constant 768 : index
    %c0_18 = arith.constant 0 : index
    %38 = vector.load %arg5[%c768_17, %c0_18] : memref<1152x512xbf16, #tpu.memory_space<vmem>>, vector<128x512xbf16>
    %cst_19 = arith.constant dense<0.000000e+00> : vector<2x512xf32>
    %39 = tpu.matmul %37, %38, %cst_19 {dimension_numbers = #tpu.dot_dimension_numbers<[1], [0], [0], [1], [0, 0, 1, 1], [], []>} : vector<2x128xbf16>, vector<128x512xbf16>, vector<2x512xf32> -> vector<2x512xf32>
    %c0_20 = arith.constant 0 : index
    %c896 = arith.constant 896 : index
    %40 = vector.load %arg2[%c0_20, %c896] : memref<1x2560xf32, #tpu.memory_space<vmem>>, vector<1x512xf32>
    %41 = vector.broadcast %40 : vector<1x512xf32> to vector<2x512xf32>
    %42 = arith.addf %39, %41 : vector<2x512xf32>
    %c3 = arith.constant 3 : index
    %43 = memref.load %arg0[%c3] : memref<7xf32, #tpu.memory_space<smem>>
    %cst_21 = arith.constant 0.000000e+00 : f32
    %44 = vector.broadcast %cst_21 : f32 to vector<2x512xf32>
    %45 = arith.cmpf oge, %42, %44 : vector<2x512xf32>
    %46 = vector.broadcast %43 : f32 to vector<2x512xf32>
    %47 = arith.mulf %46, %42 : vector<2x512xf32>
    %48 = arith.select %45, %42, %47 : vector<2x512xi1>, vector<2x512xf32>
    %49 = arith.truncf %48 : vector<2x512xf32> to vector<2x512xbf16>
    %c256 = arith.constant 256 : index
    %c0_22 = arith.constant 0 : index
    %50 = vector.load %arg3[%c256, %c0_22] : memref<768x128xbf16, #tpu.memory_space<vmem>>, vector<512x128xbf16>
    %cst_23 = arith.constant dense<0.000000e+00> : vector<2x128xf32>
    %51 = tpu.matmul %49, %50, %cst_23 {dimension_numbers = #tpu.dot_dimension_numbers<[1], [0], [0], [1], [0, 0, 1, 1], [], []>} : vector<2x512xbf16>, vector<512x128xbf16>, vector<2x128xf32> -> vector<2x128xf32>
    %c0_24 = arith.constant 0 : index
    %c1408 = arith.constant 1408 : index
    %52 = vector.load %arg2[%c0_24, %c1408] : memref<1x2560xf32, #tpu.memory_space<vmem>>, vector<1x128xf32>
    %53 = vector.broadcast %52 : vector<1x128xf32> to vector<2x128xf32>
    %54 = arith.addf %51, %53 : vector<2x128xf32>
    %c4 = arith.constant 4 : index
    %55 = memref.load %arg0[%c4] : memref<7xf32, #tpu.memory_space<smem>>
    %cst_25 = arith.constant 0.000000e+00 : f32
    %56 = vector.broadcast %cst_25 : f32 to vector<2x128xf32>
    %57 = arith.cmpf oge, %54, %56 : vector<2x128xf32>
    %58 = vector.broadcast %55 : f32 to vector<2x128xf32>
    %59 = arith.mulf %58, %54 : vector<2x128xf32>
    %60 = arith.select %57, %54, %59 : vector<2x128xi1>, vector<2x128xf32>
    %61 = arith.truncf %60 : vector<2x128xf32> to vector<2x128xbf16>
    %c512_26 = arith.constant 512 : index
    %c0_27 = arith.constant 0 : index
    %62 = vector.load %arg4[%c512_26, %c0_27] : memref<1152x256xbf16, #tpu.memory_space<vmem>>, vector<128x256xbf16>
    %cst_28 = arith.constant dense<0.000000e+00> : vector<2x256xf32>
    %63 = tpu.matmul %61, %62, %cst_28 {dimension_numbers = #tpu.dot_dimension_numbers<[1], [0], [0], [1], [0, 0, 1, 1], [], []>} : vector<2x128xbf16>, vector<128x256xbf16>, vector<2x256xf32> -> vector<2x256xf32>
    %c0_29 = arith.constant 0 : index
    %c1536 = arith.constant 1536 : index
    %64 = vector.load %arg2[%c0_29, %c1536] : memref<1x2560xf32, #tpu.memory_space<vmem>>, vector<1x256xf32>
    %65 = vector.broadcast %64 : vector<1x256xf32> to vector<2x256xf32>
    %66 = arith.addf %63, %65 : vector<2x256xf32>
    %c5 = arith.constant 5 : index
    %67 = memref.load %arg0[%c5] : memref<7xf32, #tpu.memory_space<smem>>
    %cst_30 = arith.constant 0.000000e+00 : f32
    %68 = vector.broadcast %cst_30 : f32 to vector<2x256xf32>
    %69 = arith.cmpf oge, %66, %68 : vector<2x256xf32>
    %70 = vector.broadcast %67 : f32 to vector<2x256xf32>
    %71 = arith.mulf %70, %66 : vector<2x256xf32>
    %72 = arith.select %69, %66, %71 : vector<2x256xi1>, vector<2x256xf32>
    %73 = arith.truncf %72 : vector<2x256xf32> to vector<2x256xbf16>
    %c896_31 = arith.constant 896 : index
    %c0_32 = arith.constant 0 : index
    %74 = vector.load %arg5[%c896_31, %c0_32] : memref<1152x512xbf16, #tpu.memory_space<vmem>>, vector<256x512xbf16>
    %cst_33 = arith.constant dense<0.000000e+00> : vector<2x512xf32>
    %75 = tpu.matmul %73, %74, %cst_33 {dimension_numbers = #tpu.dot_dimension_numbers<[1], [0], [0], [1], [0, 0, 1, 1], [], []>} : vector<2x256xbf16>, vector<256x512xbf16>, vector<2x512xf32> -> vector<2x512xf32>
    %c0_34 = arith.constant 0 : index
    %c1792 = arith.constant 1792 : index
    %76 = vector.load %arg2[%c0_34, %c1792] : memref<1x2560xf32, #tpu.memory_space<vmem>>, vector<1x512xf32>
    %77 = vector.broadcast %76 : vector<1x512xf32> to vector<2x512xf32>
    %78 = arith.addf %75, %77 : vector<2x512xf32>
    %c6 = arith.constant 6 : index
    %79 = memref.load %arg0[%c6] : memref<7xf32, #tpu.memory_space<smem>>
    %cst_35 = arith.constant 0.000000e+00 : f32
    %80 = vector.broadcast %cst_35 : f32 to vector<2x512xf32>
    %81 = arith.cmpf oge, %78, %80 : vector<2x512xf32>
    %82 = vector.broadcast %79 : f32 to vector<2x512xf32>
    %83 = arith.mulf %82, %78 : vector<2x512xf32>
    %84 = arith.select %81, %78, %83 : vector<2x512xi1>, vector<2x512xf32>
    %85 = arith.truncf %84 : vector<2x512xf32> to vector<2x512xbf16>
    %c640 = arith.constant 640 : index
    %c0_36 = arith.constant 0 : index
    %86 = vector.load %arg4[%c640, %c0_36] : memref<1152x256xbf16, #tpu.memory_space<vmem>>, vector<512x256xbf16>
    %cst_37 = arith.constant dense<0.000000e+00> : vector<2x256xf32>
    %87 = tpu.matmul %85, %86, %cst_37 {dimension_numbers = #tpu.dot_dimension_numbers<[1], [0], [0], [1], [0, 0, 1, 1], [], []>} : vector<2x512xbf16>, vector<512x256xbf16>, vector<2x256xf32> -> vector<2x256xf32>
    %c0_38 = arith.constant 0 : index
    %c2304 = arith.constant 2304 : index
    %88 = vector.load %arg2[%c0_38, %c2304] : memref<1x2560xf32, #tpu.memory_space<vmem>>, vector<1x256xf32>
    %89 = vector.broadcast %88 : vector<1x256xf32> to vector<2x256xf32>
    %90 = arith.addf %87, %89 : vector<2x256xf32>
    %cst_39 = arith.constant 0.000000e+00 : f32
    %91 = vector.broadcast %cst_39 : f32 to vector<2x256xf32>
    %92 = arith.subf %91, %90 : vector<2x256xf32>
    %93 = math.exp %92 : vector<2x256xf32>
    %cst_40 = arith.constant 1.000000e+00 : f32
    %94 = vector.broadcast %cst_40 : f32 to vector<2x256xf32>
    %95 = arith.addf %94, %93 : vector<2x256xf32>
    %cst_41 = arith.constant 1.000000e+00 : f32
    %96 = vector.broadcast %cst_41 : f32 to vector<2x256xf32>
    %97 = arith.divf %96, %95 : vector<2x256xf32>
    %c0_42 = arith.constant 0 : index
    %c0_43 = arith.constant 0 : index
    %98 = vector.load %arg6[%c0_42, %c0_43] : memref<2x256xf32, #tpu.memory_space<vmem>>, vector<2x256xf32>
    tpu.vector_store %arg6[%c0_42, %c0_43], %97 {strides = array<i32>} : memref<2x256xf32, #tpu.memory_space<vmem>>, vector<2x256xf32>,
    return
  }
}

</mosaic_0001>

<bundles_post_ra>
// kernel: _forward.1
= control target key start
LH: loop header
LB: loop body
LE: loop exit
PB: predicated region body
PF: predicated region fallthrough
CT: control target
= control target key end

     0   :  { %11 = vsyncpa [#allocation4], 0  ;;  %s5686_s0 = inlined_call_operand.hbm [shape: f32[7], index: 0, kind: input, shape index: {}]   ;;  %s5687_s1 = inlined_call_operand.vmem [shape: f32[2,768], index: 1, kind: input, shape index: {}]   ;;  %s5688_s2 = inlined_call_operand.hbm [shape: f32[1,2560], index: 2, kind: input, shape index: {}]   ;;  %s5689_s3 = inlined_call_operand.hbm [shape: bf16[768,128], index: 3, kind: input, shape index: {}]   ;;  %s5690_s4 = inlined_call_operand.hbm [shape: bf16[1152,256], index: 4, kind: input, shape index: {}]   ;;  %s5691_s5 = inlined_call_operand.hbm [shape: bf16[1152,512], index: 5, kind: input, shape index: {}]   ;;  %s5692_s6 = inlined_call_operand.vmem [shape: f32[2,256], index: 6, kind: output, shape index: {}]  }
   0x1   :  { %12 = vsyncpa [#allocation3], 0 }
   0x2   :  { %13 = vsyncpa [#allocation7], 0 }
   0x3   :  { %14 = vsyncpa [#allocation10], 0  ;;  %s5484_s21 = smov [#allocation6]   ;;  %s5378_s25 = scalar_lea.hbm %s5689_s3, 6144 }
   0x4   :  { %s40_s22 = sshll.u32 %s5484_s21, 4  ;;  %p5379_p0 = scmp.ne.s32.totalorder %s5689_s3, %s5378_s25  ;;  %s41_s22 = int_to_ptr.vmem [resolvable:$true] %s40_s22 }
   0x5   :  { %p5382_p1 = scmp.lt.u32.totalorder %s5378_s25, %s5689_s3 }
   0x7   :  { %p5384_p2 = pnand %p5382_p1, %p5379_p0 }
   0x9   :  { %5387 = shalt.err (!%p5384_p2)
}
   0xa   :  { %s5388_s30 = scalar_lea.vmem %s41_s22, 6144  ;;  %p5393_p4 = scmp.lt.s32.totalorder %s41_s22, %s41_s22 }
   0xb   :  { %p5389_p3 = scmp.ne.s32.totalorder %s41_s22, %s5388_s30  ;;  %p5394_p5 = scmp.lt.s32.totalorder %s5388_s30, %s5388_s30 }
   0xd   :  { %p5395_p6 = por %p5394_p5, %p5393_p4 }
   0xf   :  { %p5396_p7 = pnand %p5395_p6, %p5389_p3 }
  0x11   :  { %5399 = shalt.err (!%p5396_p7)
}
  0x12   :  { %s5485_s7 = smov 64   ;;  %s5486_s8 = smov 4  }
  0x13   :  { %46 = dma.hbm_to_vmem [thread:$0]  %s5689_s3, 6144, %s41_s22, [#allocation7], %s5485_s7, %s5485_s7, %s5486_s8  }
  0x14   :  { %s5400_s13 = scalar_lea.hbm %s5686_s0, 16 }
  0x15   :  { %p5401_p8 = scmp.ne.s32.totalorder %s5686_s0, %s5400_s13  ;;  %p5404_p9 = scmp.lt.u32.totalorder %s5400_s13, %s5686_s0 }
  0x17   :  { %p5406_p10 = pnand %p5404_p9, %p5401_p8 }
  0x19   :  { %5409 = shalt.err (!%p5406_p10)
}
  0x1a   :  { %s5487_s18 = smov [#allocation2]   ;;  %s5488_s3 = smov [#allocation5]  }
  0x1b   :  { %22 = dma.hbm_to_smem %s5686_s0, 16, %s5487_s18, [#allocation4]  }
  0x1c   :  { %s31_s21 = sshll.u32 %s5488_s3, 4  ;;  %s5489_s22 = smov [#allocation8]   ;;  %s32_s21 = int_to_ptr.vmem [resolvable:$true] %s31_s21 }
  0x1d   :  { %s52_s23 = sshll.u32 %s5489_s22, 4  ;;  %s5410_s26 = scalar_lea.hbm %s5688_s2, 320  ;;  %s5556_s23 = int_to_ptr.vmem [resolvable:$true] %s52_s23 }
  0x1e   :  { %p5411_p11 = scmp.ne.s32.totalorder %s5688_s2, %s5410_s26  ;;  %p5414_p12 = scmp.lt.u32.totalorder %s5410_s26, %s5688_s2 }
  0x20   :  { %p5416_p13 = pnand %p5414_p12, %p5411_p11 }
  0x22   :  { %5419 = shalt.err (!%p5416_p13)
}
  0x23   :  { %s5420_s0 = scalar_lea.vmem %s32_s21, 320  ;;  %p5425_p1 = scmp.lt.s32.totalorder %s32_s21, %s32_s21 }
  0x24   :  { %p5421_p0 = scmp.ne.s32.totalorder %s32_s21, %s5420_s0  ;;  %p5426_p2 = scmp.lt.s32.totalorder %s5420_s0, %s5420_s0 }
  0x26   :  { %p5427_p3 = por %p5426_p2, %p5425_p1 }
  0x28   :  { %p5428_p4 = pnand %p5427_p3, %p5421_p0 }
  0x2a   :  { %5431 = shalt.err (!%p5428_p4)
}
  0x2b   :  { %34 = dma.hbm_to_vmem [thread:$0]  %s5688_s2, 320, %s32_s21, [#allocation3]  }
  0x2c   :  { %s5432_s11 = scalar_lea.hbm %s5690_s4, 18432 }
  0x2d   :  { %p5433_p5 = scmp.ne.s32.totalorder %s5690_s4, %s5432_s11  ;;  %p5436_p6 = scmp.lt.u32.totalorder %s5432_s11, %s5690_s4 }
  0x2f   :  { %p5438_p7 = pnand %p5436_p6, %p5433_p5 }
  0x31   :  { %5441 = shalt.err (!%p5438_p7)
}
  0x32   :  { %s5442_s16 = scalar_lea.vmem %s5556_s23, 18432  ;;  %p5447_p9 = scmp.lt.s32.totalorder %s5556_s23, %s5556_s23 }
  0x33   :  { %p5443_p8 = scmp.ne.s32.totalorder %s5556_s23, %s5442_s16  ;;  %p5448_p10 = scmp.lt.s32.totalorder %s5442_s16, %s5442_s16 }
  0x35   :  { %p5449_p11 = por %p5448_p10, %p5447_p9 }
  0x37   :  { %p5450_p12 = pnand %p5449_p11, %p5443_p8 }
  0x39   :  { %5453 = shalt.err (!%p5450_p12)
}
  0x3a   :  { %s5490_s2 = smov 128   ;;  %s5491_s17 = smov 8  }
  0x3b   :  { %58 = dma.hbm_to_vmem [thread:$0]  %s5690_s4, 18432, %s5556_s23, [#allocation7], %s5490_s2, %s5490_s2, %s5491_s17  }
  0x3c   :  { %s5492_s20 = smov [#allocation9]   ;;  %s5454_s24 = scalar_lea.hbm %s5691_s5, 36864 }
  0x3d   :  { %s64_s3 = sshll.u32 %s5492_s20, 4  ;;  %p5455_p13 = scmp.ne.s32.totalorder %s5691_s5, %s5454_s24  ;;  %s65_s3 = int_to_ptr.vmem [resolvable:$true] %s64_s3 }
  0x3e   :  { %p5458_p0 = scmp.lt.u32.totalorder %s5454_s24, %s5691_s5 }
  0x40   :  { %p5460_p1 = pnand %p5458_p0, %p5455_p13 }
  0x42   :  { %5463 = shalt.err (!%p5460_p1)
}
  0x43   :  { %s5464_s29 = scalar_lea.vmem %s65_s3, 36864  ;;  %p5469_p3 = scmp.lt.s32.totalorder %s65_s3, %s65_s3 }
  0x44   :  { %p5465_p2 = scmp.ne.s32.totalorder %s65_s3, %s5464_s29  ;;  %p5470_p4 = scmp.lt.s32.totalorder %s5464_s29, %s5464_s29 }
  0x46   :  { %p5471_p5 = por %p5470_p4, %p5469_p3 }
  0x48   :  { %p5472_p6 = pnand %p5471_p5, %p5465_p2 }
  0x4a   :  { %5475 = shalt.err (!%p5472_p6)
}
  0x4b   :  { %s5493_s4 = smov 256   ;;  %s5494_s23 = smov 16  }
  0x4c   :  { %70 = dma.hbm_to_vmem [thread:$0]  %s5691_s5, 36864, %s65_s3, [#allocation10], %s5493_s4, %s5493_s4, %s5494_s23  }
  0x4d   :  { %5476 = dma.done.wait [#allocation4], 16  }
  0x4e   :  { %5477 = vsyncadd [#allocation4], 4294967280 }
  0x4f   :  { %5478 = dma.done.wait [#allocation3], 320  }
  0x50   :  { %5479 = vsyncadd [#allocation3], 4294966976 }
  0x51   :  { %5480 = dma.done.wait [#allocation7], 24576  }
  0x52   :  { %5481 = vsyncadd [#allocation7], 4294942720 }
  0x53   :  { %5482 = dma.done.wait [#allocation10], 36864  }
  0x54   :  { %5483 = vsyncadd [#allocation10], 4294930432 }
  0x55   :  { %86 = sfence }
  0x56   :  { %v4673_v0 = vld [vmem:[#allocation9 + $0x4] ss:$16 sps:$4 sm:$0xff]   ;;  %v4677_v2 = vld [vmem:[#allocation9] ss:$16 sps:$4 sm:$0xff]   ;;  %v5495_v36 = vmov 1983009808   ;;  %v96_v38 = vlaneseq }
  0x57   :  { %v4675_v1 = vld [vmem:[#allocation9 + $0x204] ss:$16 sps:$4 sm:$0xff]   ;;  %1303 = vmatprep.subr.bf16.mxu1 %v4673_v0  ;;  %v4678_v3 = vld [vmem:[#allocation9 + $0x200] ss:$16 sps:$4 sm:$0xff]   ;;  %v94_v37 = vunpack.c.l.s4 %v5495_v36  ;;  %s4331_s10 = sld [smem:[#allocation2 + $0x1]]  ;;  %s4349_s11 = sld [smem:[#allocation2 + $0x2]] }
  0x58   :  { %1344 = vmatprep.subr.bf16.mxu0 %v4675_v1  ;;  %v4679_v4 = vld [vmem:[#allocation9 + $0x24] ss:$16 sps:$4 sm:$0xff]   ;;  %1304 = vmatpush1.bf16.msra.mxu1 %v4677_v2  ;;  %v4683_v6 = vld [vmem:[#allocation9 + $0x20] ss:$16 sps:$4 sm:$0xff]   ;;  %v5599_v43 = vshrl.u32 %v96_v38, 7  ;;  %s4382_s12 = sld [smem:[#allocation2 + $0x3]] }
  0x59   :  { %1345 = vmatpush1.bf16.msra.mxu0 %v4678_v3  ;;  %v4681_v5 = vld [vmem:[#allocation9 + $0x224] ss:$16 sps:$4 sm:$0xff]   ;;  %1305 = vmatprep.subr.bf16.mxu1 %v4679_v4  ;;  %v4684_v7 = vld [vmem:[#allocation9 + $0x220] ss:$16 sps:$4 sm:$0xff]   ;;  %v95_v42 = vunpack.c.0.s8 %v94_v37  ;;  %v4805_v37 = vld [vmem:[#allocation9 + $0xac] ss:$16 sps:$4 sm:$0xff]  }
  0x5a   :  { %1346 = vmatprep.subr.bf16.mxu0 %v4681_v5  ;;  %v4685_v8 = vld [vmem:[#allocation9 + $0x44] ss:$16 sps:$4 sm:$0xff]   ;;  %v4689_v10 = vld [vmem:[#allocation9 + $0x40] ss:$16 sps:$4 sm:$0xff]   ;;  %s4416_s13 = sld [smem:[#allocation2 + $0x4]]  ;;  %s4433_s14 = sld [smem:[#allocation2 + $0x5]] }
  0x5b   :  { %v4687_v9 = vld [vmem:[#allocation9 + $0x244] ss:$16 sps:$4 sm:$0xff]   ;;  %v4690_v11 = vld [vmem:[#allocation9 + $0x240] ss:$16 sps:$4 sm:$0xff]   ;;  %v98_v49 = vsub.s32 %v95_v42, %v5599_v43  ;;  %s4498_s15 = sld [smem:[#allocation2 + $0x6]] }
  0x5c   :  { %1306 = vmatpush1.bf16.msra.mxu1 %v4683_v6  ;;  %v4691_v12 = vld [vmem:[#allocation9 + $0x64] ss:$16 sps:$4 sm:$0xff]   ;;  %v4695_v14 = vld [vmem:[#allocation9 + $0x60] ss:$16 sps:$4 sm:$0xff]  }
  0x5d   :  { %1347 = vmatpush1.bf16.msra.mxu0 %v4684_v7  ;;  %1307 = vmatprep.subr.bf16.mxu1 %v4685_v8  ;;  %v4693_v13 = vld [vmem:[#allocation9 + $0x264] ss:$16 sps:$4 sm:$0xff]   ;;  %v4696_v15 = vld [vmem:[#allocation9 + $0x260] ss:$16 sps:$4 sm:$0xff]  }
  0x5e   :  { %1348 = vmatprep.subr.bf16.mxu0 %v4687_v9  ;;  %v4697_v16 = vld [vmem:[#allocation9 + $0x84] ss:$16 sps:$4 sm:$0xff]   ;;  %v4701_v18 = vld [vmem:[#allocation9 + $0x80] ss:$16 sps:$4 sm:$0xff]  }
  0x5f   :  { %v4699_v17 = vld [vmem:[#allocation9 + $0x284] ss:$16 sps:$4 sm:$0xff]   ;;  %v4702_v19 = vld [vmem:[#allocation9 + $0x280] ss:$16 sps:$4 sm:$0xff]  }
  0x60   :  { %1308 = vmatpush1.bf16.msra.mxu1 %v4689_v10  ;;  %v4703_v20 = vld [vmem:[#allocation9 + $0xa4] ss:$16 sps:$4 sm:$0xff]   ;;  %v4707_v22 = vld [vmem:[#allocation9 + $0xa0] ss:$16 sps:$4 sm:$0xff]  }
  0x61   :  { %1349 = vmatpush1.bf16.msra.mxu0 %v4690_v11  ;;  %1309 = vmatprep.subr.bf16.mxu1 %v4691_v12  ;;  %v4705_v21 = vld [vmem:[#allocation9 + $0x2a4] ss:$16 sps:$4 sm:$0xff]   ;;  %v4708_v23 = vld [vmem:[#allocation9 + $0x2a0] ss:$16 sps:$4 sm:$0xff]  }
  0x62   :  { %1350 = vmatprep.subr.bf16.mxu0 %v4693_v13  ;;  %v4709_v24 = vld [vmem:[#allocation9 + $0xc4] ss:$16 sps:$4 sm:$0xff]   ;;  %v4713_v26 = vld [vmem:[#allocation9 + $0xc0] ss:$16 sps:$4 sm:$0xff]  }
  0x63   :  { %v4711_v25 = vld [vmem:[#allocation9 + $0x2c4] ss:$16 sps:$4 sm:$0xff]   ;;  %v4714_v27 = vld [vmem:[#allocation9 + $0x2c0] ss:$16 sps:$4 sm:$0xff]  }
  0x64   :  { %1310 = vmatpush1.bf16.msra.mxu1 %v4695_v14  ;;  %v4715_v28 = vld [vmem:[#allocation9 + $0xe4] ss:$16 sps:$4 sm:$0xff]   ;;  %v4719_v30 = vld [vmem:[#allocation9 + $0xe0] ss:$16 sps:$4 sm:$0xff]  }
  0x65   :  { %1351 = vmatpush1.bf16.msra.mxu0 %v4696_v15  ;;  %1311 = vmatprep.subr.bf16.mxu1 %v4697_v16  ;;  %v4717_v29 = vld [vmem:[#allocation9 + $0x2e4] ss:$16 sps:$4 sm:$0xff]   ;;  %v4720_v31 = vld [vmem:[#allocation9 + $0x2e0] ss:$16 sps:$4 sm:$0xff]   ;;  %v4775_v15 = vld [vmem:[#allocation9 + $0xc] ss:$16 sps:$4 sm:$0xff]  }
  0x66   :  { %1352 = vmatprep.subr.bf16.mxu0 %v4699_v17  ;;  %v4721_v32 = vld [vmem:[#allocation9 + $0x104] ss:$16 sps:$4 sm:$0xff]   ;;  %v4725_v34 = vld [vmem:[#allocation9 + $0x100] ss:$16 sps:$4 sm:$0xff]  }
  0x67   :  { %v4723_v33 = vld [vmem:[#allocation9 + $0x304] ss:$16 sps:$4 sm:$0xff]   ;;  %v4726_v35 = vld [vmem:[#allocation9 + $0x300] ss:$16 sps:$4 sm:$0xff]  }
  0x68   :  { %1312 = vmatpush1.bf16.msra.mxu1 %v4701_v18  ;;  %v4727_v39 = vld [vmem:[#allocation9 + $0x124] ss:$16 sps:$4 sm:$0xff]   ;;  %v4731_v41 = vld [vmem:[#allocation9 + $0x120] ss:$16 sps:$4 sm:$0xff]  }
  0x69   :  { %1353 = vmatpush1.bf16.msra.mxu0 %v4702_v19  ;;  %1313 = vmatprep.subr.bf16.mxu1 %v4703_v20  ;;  %v4729_v40 = vld [vmem:[#allocation9 + $0x324] ss:$16 sps:$4 sm:$0xff]   ;;  %v4732_v44 = vld [vmem:[#allocation9 + $0x320] ss:$16 sps:$4 sm:$0xff]   ;;  %v4773_v19 = vld [vmem:[#allocation9 + $0x8] ss:$16 sps:$4 sm:$0xff]  }
  0x6a   :  { %1354 = vmatprep.subr.bf16.mxu0 %v4705_v21  ;;  %v4733_v45 = vld [vmem:[#allocation9 + $0x144] ss:$16 sps:$4 sm:$0xff]   ;;  %v4737_v47 = vld [vmem:[#allocation9 + $0x140] ss:$16 sps:$4 sm:$0xff]   ;;  %v4781_v21 = vld [vmem:[#allocation9 + $0x2c] ss:$16 sps:$4 sm:$0xff]  }
  0x6b   :  { %v4735_v46 = vld [vmem:[#allocation9 + $0x344] ss:$16 sps:$4 sm:$0xff]   ;;  %v4738_v48 = vld [vmem:[#allocation9 + $0x340] ss:$16 sps:$4 sm:$0xff]  }
  0x6c   :  { %1314 = vmatpush1.bf16.msra.mxu1 %v4707_v22  ;;  %v4739_v50 = vld [vmem:[#allocation9 + $0x164] ss:$16 sps:$4 sm:$0xff]   ;;  %v88_v52 = vld [vmem:[%s5687_s1] sm:$0xff] }
  0x6d   :  { %1355 = vmatpush1.bf16.msra.mxu0 %v4708_v23  ;;  %1315 = vmatprep.subr.bf16.mxu1 %v4709_v24  ;;  %v4741_v51 = vld [vmem:[#allocation9 + $0x364] ss:$16 sps:$4 sm:$0xff]   ;;  %v4743_v53 = vld [vmem:[#allocation9 + $0x160] ss:$16 sps:$4 sm:$0xff]   ;;  %v99_v54 = vrot.slane %v88_v52, %v98_v49  ;;  %v92_v55 = vcombine.high %v88_v52, %v88_v52  ;;  %v4779_v23 = vld [vmem:[#allocation9 + $0x28] ss:$16 sps:$4 sm:$0xff]  }
  0x6e   :  { %1356 = vmatprep.subr.bf16.mxu0 %v4711_v25  ;;  %v4744_v56 = vld [vmem:[#allocation9 + $0x360] ss:$16 sps:$4 sm:$0xff]   ;;  %v4745_v57 = vld [vmem:[#allocation9 + $0x184] ss:$16 sps:$4 sm:$0xff]   ;;  %v4787_v25 = vld [vmem:[#allocation9 + $0x4c] ss:$16 sps:$4 sm:$0xff]  }
  0x6f   :  { %v4747_v58 = vld [vmem:[#allocation9 + $0x384] ss:$16 sps:$4 sm:$0xff]   ;;  %v107_v59 = vcombine.high %v99_v54, %v99_v54  ;;  %v106_v60 = vrot.slane %v92_v55, %v98_v49  ;;  %v4749_v61 = vld [vmem:[#allocation9 + $0x180] ss:$16 sps:$4 sm:$0xff]   ;;  %v5608_v16 = vpack.c.bf16 %v99_v54, %v99_v54  ;;  %v4821_v55 = vld [vmem:[#allocation9 + $0x108] ss:$16 sps:$4 sm:$0xff]  }
  0x70   :  { %1316 = vmatpush1.bf16.msra.mxu1 %v4713_v26  ;;  %v4750_v0 = vld [vmem:[#allocation9 + $0x380] ss:$16 sps:$4 sm:$0xff]   ;;  %v4751_v1 = vld [vmem:[#allocation9 + $0x1a4] ss:$16 sps:$4 sm:$0xff]  }
  0x71   :  { %1357 = vmatpush1.bf16.msra.mxu0 %v4714_v27  ;;  %1317 = vmatprep.subr.bf16.mxu1 %v4715_v28  ;;  %v124_v62 = vpack.c.bf16 %v107_v59, %v107_v59  ;;  %v108_v63 = vcombine.high %v106_v60, %v106_v60  ;;  %v4753_v2 = vld [vmem:[#allocation9 + $0x3a4] ss:$16 sps:$4 sm:$0xff]   ;;  %v4755_v4 = vld [vmem:[#allocation9 + $0x1a0] ss:$16 sps:$4 sm:$0xff]   ;;  %v5610_v18 = vpack.c.bf16 %v106_v60, %v106_v60  ;;  %v4785_v27 = vld [vmem:[#allocation9 + $0x48] ss:$16 sps:$4 sm:$0xff]  }
  0x72   :  { %1358 = vmatprep.subr.bf16.mxu0 %v4717_v29  ;;  %v4756_v5 = vld [vmem:[#allocation9 + $0x3a0] ss:$16 sps:$4 sm:$0xff]   ;;  %v4757_v6 = vld [vmem:[#allocation9 + $0x1c4] ss:$16 sps:$4 sm:$0xff]   ;;  %v4793_v29 = vld [vmem:[#allocation9 + $0x6c] ss:$16 sps:$4 sm:$0xff]  }
  0x73   :  { %v5605_v3 = vpack.c.bf16 %v108_v63, %v108_v63  ;;  %1335 = vmatprep.mubr.bf16.mxu1 %v124_v62  ;;  %v4759_v7 = vld [vmem:[#allocation9 + $0x3c4] ss:$16 sps:$4 sm:$0xff]   ;;  %v4761_v8 = vld [vmem:[#allocation9 + $0x1c0] ss:$16 sps:$4 sm:$0xff]   ;;  %v4827_v59 = vld [vmem:[#allocation9 + $0x128] ss:$16 sps:$4 sm:$0xff]  }
  0x74   :  { %1318 = vmatpush1.bf16.msra.mxu1 %v4719_v30  ;;  %v4762_v9 = vld [vmem:[#allocation9 + $0x3c0] ss:$16 sps:$4 sm:$0xff]   ;;  %v4763_v10 = vld [vmem:[#allocation9 + $0x1e4] ss:$16 sps:$4 sm:$0xff]   ;;  %v4833_v63 = vld [vmem:[#allocation9 + $0x148] ss:$16 sps:$4 sm:$0xff]  }
  0x75   :  { %1359 = vmatpush1.bf16.msra.mxu0 %v4720_v31  ;;  %1319 = vmatprep.subr.bf16.mxu1 %v4721_v32  ;;  %v4765_v11 = vld [vmem:[#allocation9 + $0x3e4] ss:$16 sps:$4 sm:$0xff]   ;;  %v4767_v12 = vld [vmem:[#allocation9 + $0x1e0] ss:$16 sps:$4 sm:$0xff]   ;;  %v4791_v31 = vld [vmem:[#allocation9 + $0x68] ss:$16 sps:$4 sm:$0xff]  }
  0x76   :  { %1360 = vmatprep.subr.bf16.mxu0 %v4723_v33  ;;  %1376 = vmatprep.mubr.bf16.mxu0 %v5605_v3  ;;  %v4768_v13 = vld [vmem:[#allocation9 + $0x3e0] ss:$16 sps:$4 sm:$0xff]   ;;  %v4772_v14 = vld [vmem:[#allocation9 + $0x404] ss:$16 sps:$4 sm:$0xff]   ;;  %v4799_v33 = vld [vmem:[#allocation9 + $0x8c] ss:$16 sps:$4 sm:$0xff]  }
  0x77   :  { %v4770_v17 = vld [vmem:[#allocation9 + $0x400] ss:$16 sps:$4 sm:$0xff]   ;;  %v4778_v20 = vld [vmem:[#allocation9 + $0x424] ss:$16 sps:$4 sm:$0xff]  }
  0x78   :  { %1320 = vmatpush1.bf16.msra.mxu1 %v4725_v34  ;;  %v4776_v22 = vld [vmem:[#allocation9 + $0x420] ss:$16 sps:$4 sm:$0xff]   ;;  %v4784_v24 = vld [vmem:[#allocation9 + $0x444] ss:$16 sps:$4 sm:$0xff]  }
  0x79   :  { %1361 = vmatpush1.bf16.msra.mxu0 %v4726_v35  ;;  %1321 = vmatprep.subr.bf16.mxu1 %v4727_v39  ;;  %v4782_v26 = vld [vmem:[#allocation9 + $0x440] ss:$16 sps:$4 sm:$0xff]   ;;  %v4790_v28 = vld [vmem:[#allocation9 + $0x464] ss:$16 sps:$4 sm:$0xff]   ;;  %v4797_v35 = vld [vmem:[#allocation9 + $0x88] ss:$16 sps:$4 sm:$0xff]  }
  0x7a   :  { %1362 = vmatprep.subr.bf16.mxu0 %v4729_v40  ;;  %v4788_v30 = vld [vmem:[#allocation9 + $0x460] ss:$16 sps:$4 sm:$0xff]   ;;  %v4796_v32 = vld [vmem:[#allocation9 + $0x484] ss:$16 sps:$4 sm:$0xff]   ;;  %v4803_v39 = vld [vmem:[#allocation9 + $0xa8] ss:$16 sps:$4 sm:$0xff]  }
  0x7b   :  { %v4794_v34 = vld [vmem:[#allocation9 + $0x480] ss:$16 sps:$4 sm:$0xff]   ;;  %v4802_v36 = vld [vmem:[#allocation9 + $0x4a4] ss:$16 sps:$4 sm:$0xff]  }
  0x7c   :  { %1322 = vmatpush1.bf16.msra.mxu1 %v4731_v41  ;;  %v4800_v38 = vld [vmem:[#allocation9 + $0x4a0] ss:$16 sps:$4 sm:$0xff]   ;;  %v4808_v40 = vld [vmem:[#allocation9 + $0x4c4] ss:$16 sps:$4 sm:$0xff]   ;;  %v4811_v41 = vld [vmem:[#allocation9 + $0xcc] ss:$16 sps:$4 sm:$0xff]  }
  0x7d   :  { %1363 = vmatpush1.bf16.msra.mxu0 %v4732_v44  ;;  %1323 = vmatprep.subr.bf16.mxu1 %v4733_v45  ;;  %v5617_v42 = vld.sshfl [vmem:[%s5687_s1 + $0x8] sm:$0x33 pattern:$0x76325410]  ;;  %v4806_v45 = vld [vmem:[#allocation9 + $0x4c0] ss:$16 sps:$4 sm:$0xff]  }
  0x7e   :  { %1364 = vmatprep.subr.bf16.mxu0 %v4735_v46  ;;  %v116_v44 = vcombine.high %v5617_v42, %v5617_v42  ;;  %v4809_v46 = vld [vmem:[#allocation9 + $0xc8] ss:$16 sps:$4 sm:$0xff]   ;;  %v4820_v52 = vld [vmem:[#allocation9 + $0x504] ss:$16 sps:$4 sm:$0xff]   ;;  %v4818_v54 = vld [vmem:[#allocation9 + $0x500] ss:$16 sps:$4 sm:$0xff]  }
  0x7f   :  { %v4832_v60 = vld [vmem:[#allocation9 + $0x544] ss:$16 sps:$4 sm:$0xff]   ;;  %s1549_s1 = sld [smem:[#allocation2]] }
  0x80   :  { %1324 = vmatpush1.bf16.msra.mxu1 %v4737_v47  ;;  %v4814_v47 = vld [vmem:[#allocation9 + $0x4e4] ss:$16 sps:$4 sm:$0xff]   ;;  %v5621_v49 = vpack.c.bf16 %v116_v44, %v116_v44 }
  0x81   :  { %1365 = vmatpush1.bf16.msra.mxu0 %v4738_v48  ;;  %1325 = vmatprep.subr.bf16.mxu1 %v4739_v50  ;;  %v4817_v48 = vld [vmem:[#allocation9 + $0xec] ss:$16 sps:$4 sm:$0xff]   ;;  %v4812_v50 = vld [vmem:[#allocation9 + $0x4e0] ss:$16 sps:$4 sm:$0xff]  }
  0x82   :  { %1366 = vmatprep.subr.bf16.mxu0 %v4741_v51  ;;  %v4815_v51 = vld [vmem:[#allocation9 + $0xe8] ss:$16 sps:$4 sm:$0xff]   ;;  %v4970_v44 = vld [vmem:[#allocation8 + $0x24] ss:$8 sps:$4 sm:$0xff]  }
  0x84   :  { %1326 = vmatpush1.bf16.msra.mxu1 %v4743_v53  ;;  %v4823_v53 = vld [vmem:[#allocation9 + $0x10c] ss:$16 sps:$4 sm:$0xff]  }
  0x85   :  { %1367 = vmatpush1.bf16.msra.mxu0 %v4744_v56  ;;  %1327 = vmatprep.subr.bf16.mxu1 %v4745_v57  ;;  %v4826_v56 = vld [vmem:[#allocation9 + $0x524] ss:$16 sps:$4 sm:$0xff]   ;;  %v4829_v57 = vld [vmem:[#allocation9 + $0x12c] ss:$16 sps:$4 sm:$0xff]  }
  0x86   :  { %1368 = vmatprep.subr.bf16.mxu0 %v4747_v58  ;;  %v4824_v58 = vld [vmem:[#allocation9 + $0x520] ss:$16 sps:$4 sm:$0xff]  }
  0x88   :  { %1328 = vmatpush1.bf16.msra.mxu1 %v4749_v61  ;;  %v4835_v61 = vld [vmem:[#allocation9 + $0x14c] ss:$16 sps:$4 sm:$0xff]  }
  0x89   :  { %1369 = vmatpush1.bf16.msra.mxu0 %v4750_v0  ;;  %1329 = vmatprep.subr.bf16.mxu1 %v4751_v1  ;;  %v4838_v0 = vld [vmem:[#allocation9 + $0x564] ss:$16 sps:$4 sm:$0xff]   ;;  %v4841_v1 = vld [vmem:[#allocation9 + $0x16c] ss:$16 sps:$4 sm:$0xff]  }
  0x8a   :  { %1370 = vmatprep.subr.bf16.mxu0 %v4753_v2  ;;  %v4836_v2 = vld [vmem:[#allocation9 + $0x560] ss:$16 sps:$4 sm:$0xff]  }
  0x8c   :  { %1330 = vmatpush1.bf16.msra.mxu1 %v4755_v4  ;;  %v4839_v4 = vld [vmem:[#allocation9 + $0x168] ss:$16 sps:$4 sm:$0xff]  }
  0x8d   :  { %1371 = vmatpush1.bf16.msra.mxu0 %v4756_v5  ;;  %1331 = vmatprep.subr.bf16.mxu1 %v4757_v6  ;;  %v4844_v5 = vld [vmem:[#allocation9 + $0x584] ss:$16 sps:$4 sm:$0xff]   ;;  %v4847_v6 = vld [vmem:[#allocation9 + $0x18c] ss:$16 sps:$4 sm:$0xff]  }
  0x8e   :  { %1372 = vmatprep.subr.bf16.mxu0 %v4759_v7  ;;  %v4842_v7 = vld [vmem:[#allocation9 + $0x580] ss:$16 sps:$4 sm:$0xff]  }
  0x90   :  { %1332 = vmatpush1.bf16.msra.mxu1 %v4761_v8  ;;  %v4845_v8 = vld [vmem:[#allocation9 + $0x188] ss:$16 sps:$4 sm:$0xff]  }
  0x91   :  { %1373 = vmatpush1.bf16.msra.mxu0 %v4762_v9  ;;  %1333 = vmatprep.subr.bf16.mxu1 %v4763_v10  ;;  %v4850_v9 = vld [vmem:[#allocation9 + $0x5a4] ss:$16 sps:$4 sm:$0xff]   ;;  %v4853_v10 = vld [vmem:[#allocation9 + $0x1ac] ss:$16 sps:$4 sm:$0xff]  }
  0x92   :  { %1374 = vmatprep.subr.bf16.mxu0 %v4765_v11  ;;  %v4848_v11 = vld [vmem:[#allocation9 + $0x5a0] ss:$16 sps:$4 sm:$0xff]  }
  0x94   :  { %1334 = vmatpush1.bf16.msra.mxu1 %v4767_v12  ;;  %v4851_v12 = vld [vmem:[#allocation9 + $0x1a8] ss:$16 sps:$4 sm:$0xff]  }
  0x95   :  { %1375 = vmatpush1.bf16.msra.mxu0 %v4768_v13  ;;  %1426 = vmatprep.subr.bf16.mxu1 %v4775_v15  ;;  %v4856_v13 = vld [vmem:[#allocation9 + $0x5c4] ss:$16 sps:$4 sm:$0xff]   ;;  %v4854_v15 = vld [vmem:[#allocation9 + $0x5c0] ss:$16 sps:$4 sm:$0xff]  }
  0x96   :  { %1385 = vmatprep.subr.bf16.mxu0 %v4772_v14  ;;  %v4859_v14 = vld [vmem:[#allocation9 + $0x1cc] ss:$16 sps:$4 sm:$0xff]  }
  0x97   :  { %1336 = vmatmul.mubr.bf16.vlgmr.msra.gmra.mrb[0].mxu1 %v5608_v16 }
  0x98   :  { %1377 = vmatmul.mubr.bf16.vlgmr.msra.gmra.mrb[0].mxu0 %v5610_v18  ;;  %1427 = vmatpush1.bf16.msra.mxu1 %v4773_v19  ;;  %v4862_v19 = vld [vmem:[#allocation9 + $0x5e4] ss:$16 sps:$4 sm:$0xff]  }
  0x99   :  { %1386 = vmatpush1.bf16.msra.mxu0 %v4770_v17  ;;  %1428 = vmatprep.subr.bf16.mxu1 %v4781_v21  ;;  %v4857_v17 = vld [vmem:[#allocation9 + $0x1c8] ss:$16 sps:$4 sm:$0xff]   ;;  %v4860_v21 = vld [vmem:[#allocation9 + $0x5e0] ss:$16 sps:$4 sm:$0xff]  }
  0x9a   :  { %1387 = vmatprep.subr.bf16.mxu0 %v4778_v20  ;;  %1458 = vmatprep.mubr.bf16.mxu1 %v124_v62  ;;  %v4830_v62 = vld [vmem:[#allocation9 + $0x540] ss:$16 sps:$4 sm:$0xff]   ;;  %v4865_v20 = vld [vmem:[#allocation9 + $0x1ec] ss:$16 sps:$4 sm:$0xff]  }
  0x9b   :  { %1417 = vmatprep.mubr.bf16.mxu0 %v5621_v49 }
  0x9c   :  { %1429 = vmatpush1.bf16.msra.mxu1 %v4779_v23  ;;  %v4868_v23 = vld [vmem:[#allocation9 + $0x20c] ss:$16 sps:$4 sm:$0xff]  }
  0x9d   :  { %1388 = vmatpush1.bf16.msra.mxu0 %v4776_v22  ;;  %1430 = vmatprep.subr.bf16.mxu1 %v4787_v25  ;;  %v4863_v22 = vld [vmem:[#allocation9 + $0x1e8] ss:$16 sps:$4 sm:$0xff]  }
  0x9e   :  { %1389 = vmatprep.subr.bf16.mxu0 %v4784_v24  ;;  %v5626_v24 = vpack.c.bf16 %v5617_v42, %v5617_v42  ;;  %v4866_v25 = vld [vmem:[#allocation9 + $0x208] ss:$16 sps:$4 sm:$0xff]   ;;  %v4892_v42 = vld [vmem:[#allocation9 + $0x30c] ss:$16 sps:$4 sm:$0xff]  }
  0xa0   :  { %1431 = vmatpush1.bf16.msra.mxu1 %v4785_v27  ;;  %v4869_v27 = vld [vmem:[#allocation9 + $0x228] ss:$16 sps:$4 sm:$0xff]  }
  0xa1   :  { %1390 = vmatpush1.bf16.msra.mxu0 %v4782_v26  ;;  %1432 = vmatprep.subr.bf16.mxu1 %v4793_v29  ;;  %v4871_v26 = vld [vmem:[#allocation9 + $0x22c] ss:$16 sps:$4 sm:$0xff]   ;;  %v4872_v29 = vld [vmem:[#allocation9 + $0x248] ss:$16 sps:$4 sm:$0xff]  }
  0xa2   :  { %1391 = vmatprep.subr.bf16.mxu0 %v4790_v28  ;;  %v4874_v28 = vld [vmem:[#allocation9 + $0x24c] ss:$16 sps:$4 sm:$0xff]  }
  0xa4   :  { %1433 = vmatpush1.bf16.msra.mxu1 %v4791_v31  ;;  %v4875_v31 = vld [vmem:[#allocation9 + $0x268] ss:$16 sps:$4 sm:$0xff]  }
  0xa5   :  { %1392 = vmatpush1.bf16.msra.mxu0 %v4788_v30  ;;  %1434 = vmatprep.subr.bf16.mxu1 %v4799_v33  ;;  %v4877_v30 = vld [vmem:[#allocation9 + $0x26c] ss:$16 sps:$4 sm:$0xff]   ;;  %v4878_v33 = vld [vmem:[#allocation9 + $0x288] ss:$16 sps:$4 sm:$0xff]  }
  0xa6   :  { %1393 = vmatprep.subr.bf16.mxu0 %v4796_v32  ;;  %v4880_v32 = vld [vmem:[#allocation9 + $0x28c] ss:$16 sps:$4 sm:$0xff]  }
  0xa8   :  { %1435 = vmatpush1.bf16.msra.mxu1 %v4797_v35  ;;  %v4881_v35 = vld [vmem:[#allocation9 + $0x2a8] ss:$16 sps:$4 sm:$0xff]  }
  0xa9   :  { %1394 = vmatpush1.bf16.msra.mxu0 %v4794_v34  ;;  %1436 = vmatprep.subr.bf16.mxu1 %v4805_v37  ;;  %v4883_v34 = vld [vmem:[#allocation9 + $0x2ac] ss:$16 sps:$4 sm:$0xff]   ;;  %v4962_v37 = vld [vmem:[#allocation8] ss:$8 sps:$4 sm:$0xff]  }
  0xaa   :  { %1395 = vmatprep.subr.bf16.mxu0 %v4802_v36  ;;  %v4886_v36 = vld [vmem:[#allocation9 + $0x2cc] ss:$16 sps:$4 sm:$0xff]  }
  0xac   :  { %1437 = vmatpush1.bf16.msra.mxu1 %v4803_v39  ;;  %v4967_v39 = vld [vmem:[#allocation8 + $0x14] ss:$8 sps:$4 sm:$0xff]  }
  0xad   :  { %1396 = vmatpush1.bf16.msra.mxu0 %v4800_v38  ;;  %1438 = vmatprep.subr.bf16.mxu1 %v4811_v41  ;;  %v4964_v38 = vld [vmem:[#allocation8 + $0x4] ss:$8 sps:$4 sm:$0xff]   ;;  %v4965_v41 = vld [vmem:[#allocation8 + $0x10] ss:$8 sps:$4 sm:$0xff]  }
  0xae   :  { %1397 = vmatprep.subr.bf16.mxu0 %v4808_v40  ;;  %v4887_v40 = vld [vmem:[#allocation9 + $0x2e8] ss:$16 sps:$4 sm:$0xff]  }
  0xb0   :  { %1439 = vmatpush1.bf16.msra.mxu1 %v4809_v46  ;;  %v4968_v46 = vld [vmem:[#allocation8 + $0x20] ss:$8 sps:$4 sm:$0xff]  }
  0xb1   :  { %1398 = vmatpush1.bf16.msra.mxu0 %v4806_v45  ;;  %1440 = vmatprep.subr.bf16.mxu1 %v4817_v48  ;;  %v4890_v45 = vld [vmem:[#allocation9 + $0x308] ss:$16 sps:$4 sm:$0xff]   ;;  %v4973_v48 = vld [vmem:[#allocation8 + $0x34] ss:$8 sps:$4 sm:$0xff]  }
  0xb2   :  { %1399 = vmatprep.subr.bf16.mxu0 %v4814_v47  ;;  %v4895_v47 = vld [vmem:[#allocation9 + $0x32c] ss:$16 sps:$4 sm:$0xff]  }
  0xb4   :  { %1441 = vmatpush1.bf16.msra.mxu1 %v4815_v51  ;;  %v4971_v51 = vld [vmem:[#allocation8 + $0x30] ss:$8 sps:$4 sm:$0xff]  }
  0xb5   :  { %1400 = vmatpush1.bf16.msra.mxu0 %v4812_v50  ;;  %1442 = vmatprep.subr.bf16.mxu1 %v4823_v53  ;;  %v4893_v50 = vld [vmem:[#allocation9 + $0x328] ss:$16 sps:$4 sm:$0xff]   ;;  %v4976_v53 = vld [vmem:[#allocation8 + $0x44] ss:$8 sps:$4 sm:$0xff]  }
  0xb6   :  { %1401 = vmatprep.subr.bf16.mxu0 %v4820_v52  ;;  %v4898_v52 = vld [vmem:[#allocation9 + $0x34c] ss:$16 sps:$4 sm:$0xff]  }
  0xb8   :  { %1443 = vmatpush1.bf16.msra.mxu1 %v4821_v55  ;;  %v4974_v55 = vld [vmem:[#allocation8 + $0x40] ss:$8 sps:$4 sm:$0xff]  }
  0xb9   :  { %1402 = vmatpush1.bf16.msra.mxu0 %v4818_v54  ;;  %1444 = vmatprep.subr.bf16.mxu1 %v4829_v57  ;;  %v4896_v54 = vld [vmem:[#allocation9 + $0x348] ss:$16 sps:$4 sm:$0xff]   ;;  %v4979_v57 = vld [vmem:[#allocation8 + $0x54] ss:$8 sps:$4 sm:$0xff]  }
  0xba   :  { %1403 = vmatprep.subr.bf16.mxu0 %v4826_v56  ;;  %v4901_v56 = vld [vmem:[#allocation9 + $0x36c] ss:$16 sps:$4 sm:$0xff]  }
  0xbc   :  { %1445 = vmatpush1.bf16.msra.mxu1 %v4827_v59  ;;  %v4977_v59 = vld [vmem:[#allocation8 + $0x50] ss:$8 sps:$4 sm:$0xff]  }
  0xbd   :  { %1404 = vmatpush1.bf16.msra.mxu0 %v4824_v58  ;;  %1446 = vmatprep.subr.bf16.mxu1 %v4835_v61  ;;  %v4899_v58 = vld [vmem:[#allocation9 + $0x368] ss:$16 sps:$4 sm:$0xff]   ;;  %v4982_v61 = vld [vmem:[#allocation8 + $0x64] ss:$8 sps:$4 sm:$0xff]  }
  0xbe   :  { %1405 = vmatprep.subr.bf16.mxu0 %v4832_v60  ;;  %v4904_v60 = vld [vmem:[#allocation9 + $0x38c] ss:$16 sps:$4 sm:$0xff]  }
  0xc0   :  { %1447 = vmatpush1.bf16.msra.mxu1 %v4833_v63  ;;  %v4980_v63 = vld [vmem:[#allocation8 + $0x60] ss:$8 sps:$4 sm:$0xff]  }
  0xc1   :  { %1406 = vmatpush1.bf16.msra.mxu0 %v4830_v62  ;;  %1448 = vmatprep.subr.bf16.mxu1 %v4841_v1  ;;  %v4902_v62 = vld [vmem:[#allocation9 + $0x388] ss:$16 sps:$4 sm:$0xff]   ;;  %v4985_v1 = vld [vmem:[#allocation8 + $0x74] ss:$8 sps:$4 sm:$0xff]  }
  0xc2   :  { %1407 = vmatprep.subr.bf16.mxu0 %v4838_v0  ;;  %v4907_v0 = vld [vmem:[#allocation9 + $0x3ac] ss:$16 sps:$4 sm:$0xff]  }
  0xc4   :  { %1449 = vmatpush1.bf16.msra.mxu1 %v4839_v4  ;;  %v4983_v4 = vld [vmem:[#allocation8 + $0x70] ss:$8 sps:$4 sm:$0xff]  }
  0xc5   :  { %1408 = vmatpush1.bf16.msra.mxu0 %v4836_v2  ;;  %1450 = vmatprep.subr.bf16.mxu1 %v4847_v6  ;;  %v4905_v2 = vld [vmem:[#allocation9 + $0x3a8] ss:$16 sps:$4 sm:$0xff]   ;;  %v4988_v6 = vld [vmem:[#allocation8 + $0x84] ss:$8 sps:$4 sm:$0xff]  }
  0xc6   :  { %1409 = vmatprep.subr.bf16.mxu0 %v4844_v5  ;;  %v4910_v5 = vld [vmem:[#allocation9 + $0x3cc] ss:$16 sps:$4 sm:$0xff]  }
  0xc8   :  { %1451 = vmatpush1.bf16.msra.mxu1 %v4845_v8  ;;  %v4986_v8 = vld [vmem:[#allocation8 + $0x80] ss:$8 sps:$4 sm:$0xff]  }
  0xc9   :  { %1410 = vmatpush1.bf16.msra.mxu0 %v4842_v7  ;;  %1452 = vmatprep.subr.bf16.mxu1 %v4853_v10  ;;  %v4908_v7 = vld [vmem:[#allocation9 + $0x3c8] ss:$16 sps:$4 sm:$0xff]   ;;  %v4991_v10 = vld [vmem:[#allocation8 + $0x94] ss:$8 sps:$4 sm:$0xff]  }
  0xca   :  { %1411 = vmatprep.subr.bf16.mxu0 %v4850_v9  ;;  %v4913_v9 = vld [vmem:[#allocation9 + $0x3ec] ss:$16 sps:$4 sm:$0xff]  }
  0xcc   :  { %1453 = vmatpush1.bf16.msra.mxu1 %v4851_v12  ;;  %v4989_v12 = vld [vmem:[#allocation8 + $0x90] ss:$8 sps:$4 sm:$0xff]  }
  0xcd   :  { %1412 = vmatpush1.bf16.msra.mxu0 %v4848_v11  ;;  %1454 = vmatprep.subr.bf16.mxu1 %v4859_v14  ;;  %v4911_v11 = vld [vmem:[#allocation9 + $0x3e8] ss:$16 sps:$4 sm:$0xff]   ;;  %v4994_v14 = vld [vmem:[#allocation8 + $0xa4] ss:$8 sps:$4 sm:$0xff]  }
  0xce   :  { %1413 = vmatprep.subr.bf16.mxu0 %v4856_v13  ;;  %v4916_v13 = vld [vmem:[#allocation9 + $0x40c] ss:$16 sps:$4 sm:$0xff]  }
  0xd0   :  { %1455 = vmatpush1.bf16.msra.mxu1 %v4857_v17  ;;  %v4919_v17 = vld [vmem:[#allocation9 + $0x42c] ss:$16 sps:$4 sm:$0xff]  }
  0xd1   :  { %1414 = vmatpush1.bf16.msra.mxu0 %v4854_v15  ;;  %1456 = vmatprep.subr.bf16.mxu1 %v4865_v20  ;;  %v4914_v15 = vld [vmem:[#allocation9 + $0x408] ss:$16 sps:$4 sm:$0xff]   ;;  %v4997_v20 = vld [vmem:[#allocation8 + $0xb4] ss:$8 sps:$4 sm:$0xff]  }
  0xd2   :  { %1415 = vmatprep.subr.bf16.mxu0 %v4862_v19  ;;  %v4992_v19 = vld [vmem:[#allocation8 + $0xa0] ss:$8 sps:$4 sm:$0xff]  }
  0xd4   :  { %1457 = vmatpush1.bf16.msra.mxu1 %v4863_v22  ;;  %v4922_v22 = vld [vmem:[#allocation9 + $0x44c] ss:$16 sps:$4 sm:$0xff]  }
  0xd5   :  { %1416 = vmatpush1.bf16.msra.mxu0 %v4860_v21  ;;  %1467 = vmatprep.subr.bf16.mxu1 %v4868_v23  ;;  %v4917_v21 = vld [vmem:[#allocation9 + $0x428] ss:$16 sps:$4 sm:$0xff]  }
  0xd6   :  { %1963 = vmatprep.subr.bf16.mxu0 %v4964_v38  ;;  %v4995_v23 = vld [vmem:[#allocation8 + $0xb0] ss:$8 sps:$4 sm:$0xff]   ;;  %v5009_v38 = vld [vmem:[#allocation8 + $0xf4] ss:$8 sps:$4 sm:$0xff]  }
  0xd7   :  { %1459 = vmatmul.mubr.bf16.vlgmr.msra.gmra.mrb[4].mxu1 %v5608_v16  ;;  %v4884_v16 = vld [vmem:[#allocation9 + $0x2c8] ss:$16 sps:$4 sm:$0xff]  }
  0xd8   :  { %1418 = vmatmul.mubr.bf16.vlgmr.msra.gmra.mrb[0].mxu0 %v5626_v24  ;;  %1468 = vmatpush1.bf16.msra.mxu1 %v4866_v25  ;;  %v5000_v25 = vld [vmem:[#allocation8 + $0xc4] ss:$8 sps:$4 sm:$0xff]  }
  0xd9   :  { %1499 = vmatprep.mubr.bf16.mxu1 %v5605_v3  ;;  %1469 = vmatprep.subr.bf16.mxu1 %v4871_v26  ;;  %v4889_v3 = vld [vmem:[#allocation9 + $0x2ec] ss:$16 sps:$4 sm:$0xff]   ;;  %v4920_v26 = vld [vmem:[#allocation9 + $0x448] ss:$16 sps:$4 sm:$0xff]  }
  0xda   :  { %1964 = vmatpush1.bf16.msra.mxu0 %v4962_v37  ;;  %v4935_v37 = vld [vmem:[#allocation9 + $0x4e8] ss:$16 sps:$4 sm:$0xff]  }
  0xdb   :  { %1965 = vmatprep.subr.bf16.mxu0 %v4967_v39  ;;  %v4940_v39 = vld [vmem:[#allocation9 + $0x50c] ss:$16 sps:$4 sm:$0xff]  }
  0xdc   :  { %1470 = vmatpush1.bf16.msra.mxu1 %v4869_v27  ;;  %v4925_v27 = vld [vmem:[#allocation9 + $0x46c] ss:$16 sps:$4 sm:$0xff]  }
  0xdd   :  { %1471 = vmatprep.subr.bf16.mxu1 %v4874_v28  ;;  %v4998_v28 = vld [vmem:[#allocation8 + $0xc0] ss:$8 sps:$4 sm:$0xff]  }
  0xde   :  { %1966 = vmatpush1.bf16.msra.mxu0 %v4965_v41  ;;  %v4938_v41 = vld [vmem:[#allocation9 + $0x508] ss:$16 sps:$4 sm:$0xff]  }
  0xdf   :  { %1967 = vmatprep.subr.bf16.mxu0 %v4970_v44  ;;  %v4943_v44 = vld [vmem:[#allocation9 + $0x52c] ss:$16 sps:$4 sm:$0xff]  }
  0xe0   :  { %1472 = vmatpush1.bf16.msra.mxu1 %v4872_v29  ;;  %v5003_v29 = vld [vmem:[#allocation8 + $0xd4] ss:$8 sps:$4 sm:$0xff]  }
  0xe1   :  { %1473 = vmatprep.subr.bf16.mxu1 %v4877_v30  ;;  %v4923_v30 = vld [vmem:[#allocation9 + $0x468] ss:$16 sps:$4 sm:$0xff]  }
  0xe2   :  { %1968 = vmatpush1.bf16.msra.mxu0 %v4968_v46  ;;  %v4946_v46 = vld [vmem:[#allocation9 + $0x54c] ss:$16 sps:$4 sm:$0xff]  }
  0xe3   :  { %1969 = vmatprep.subr.bf16.mxu0 %v4973_v48  ;;  %v4949_v48 = vld [vmem:[#allocation9 + $0x56c] ss:$16 sps:$4 sm:$0xff]  }
  0xe4   :  { %1474 = vmatpush1.bf16.msra.mxu1 %v4875_v31  ;;  %v4928_v31 = vld [vmem:[#allocation9 + $0x48c] ss:$16 sps:$4 sm:$0xff]  }
  0xe5   :  { %1475 = vmatprep.subr.bf16.mxu1 %v4880_v32  ;;  %v4926_v32 = vld [vmem:[#allocation9 + $0x488] ss:$16 sps:$4 sm:$0xff]  }
  0xe6   :  { %1970 = vmatpush1.bf16.msra.mxu0 %v4971_v51  ;;  %v4952_v51 = vld [vmem:[#allocation9 + $0x58c] ss:$16 sps:$4 sm:$0xff]  }
  0xe7   :  { %1971 = vmatprep.subr.bf16.mxu0 %v4976_v53  ;;  %v4955_v53 = vld [vmem:[#allocation9 + $0x5ac] ss:$16 sps:$4 sm:$0xff]  }
  0xe8   :  { %1476 = vmatpush1.bf16.msra.mxu1 %v4878_v33  ;;  %v4929_v33 = vld [vmem:[#allocation9 + $0x4a8] ss:$16 sps:$4 sm:$0xff]  }
  0xe9   :  { %1477 = vmatprep.subr.bf16.mxu1 %v4883_v34  ;;  %v4934_v34 = vld [vmem:[#allocation9 + $0x4cc] ss:$16 sps:$4 sm:$0xff]  }
  0xea   :  { %1972 = vmatpush1.bf16.msra.mxu0 %v4974_v55  ;;  %v4958_v55 = vld [vmem:[#allocation9 + $0x5cc] ss:$16 sps:$4 sm:$0xff]  }
  0xeb   :  { %1973 = vmatprep.subr.bf16.mxu0 %v4979_v57  ;;  %v4961_v57 = vld [vmem:[#allocation9 + $0x5ec] ss:$16 sps:$4 sm:$0xff]  }
  0xec   :  { %1478 = vmatpush1.bf16.msra.mxu1 %v4881_v35  ;;  %v4932_v35 = vld [vmem:[#allocation9 + $0x4c8] ss:$16 sps:$4 sm:$0xff]  }
  0xed   :  { %1479 = vmatprep.subr.bf16.mxu1 %v4886_v36  ;;  %v5006_v36 = vld [vmem:[#allocation8 + $0xe4] ss:$8 sps:$4 sm:$0xff]  }
  0xee   :  { %1974 = vmatpush1.bf16.msra.mxu0 %v4977_v59 }
  0xef   :  { %1975 = vmatprep.subr.bf16.mxu0 %v4982_v61 }
  0xf0   :  { %1480 = vmatpush1.bf16.msra.mxu1 %v4884_v16  ;;  %v4937_v16 = vld [vmem:[#allocation9 + $0x4ec] ss:$16 sps:$4 sm:$0xff]  }
  0xf1   :  { %1481 = vmatprep.subr.bf16.mxu1 %v4889_v3  ;;  %v5004_v3 = vld [vmem:[#allocation8 + $0xe0] ss:$8 sps:$4 sm:$0xff]  }
  0xf2   :  { %1976 = vmatpush1.bf16.msra.mxu0 %v4980_v63  ;;  %v5635_v63 = vsub.s32 0, %v5599_v43 }
  0xf3   :  { %1977 = vmatprep.subr.bf16.mxu0 %v4985_v1  ;;  %v5640_v1 = vsub.s32 1, %v5599_v43 }
  0xf4   :  { %1482 = vmatpush1.bf16.msra.mxu1 %v4887_v40  ;;  %v5007_v40 = vld [vmem:[#allocation8 + $0xf0] ss:$8 sps:$4 sm:$0xff]  }
  0xf5   :  { %1483 = vmatprep.subr.bf16.mxu1 %v4892_v42  ;;  %v5012_v42 = vld [vmem:[#allocation8 + $0x104] ss:$8 sps:$4 sm:$0xff]  }
  0xf6   :  { %1978 = vmatpush1.bf16.msra.mxu0 %v4983_v4 }
  0xf7   :  { %1979 = vmatprep.subr.bf16.mxu0 %v4988_v6 }
  0xf8   :  { %1484 = vmatpush1.bf16.msra.mxu1 %v4890_v45  ;;  %v4941_v45 = vld [vmem:[#allocation9 + $0x528] ss:$16 sps:$4 sm:$0xff]  }
  0xf9   :  { %1485 = vmatprep.subr.bf16.mxu1 %v4895_v47  ;;  %v4944_v47 = vld [vmem:[#allocation9 + $0x548] ss:$16 sps:$4 sm:$0xff]  }
  0xfa   :  { %1980 = vmatpush1.bf16.msra.mxu0 %v4986_v8 }
  0xfb   :  { %1981 = vmatprep.subr.bf16.mxu0 %v4991_v10 }
  0xfc   :  { %1486 = vmatpush1.bf16.msra.mxu1 %v4893_v50  ;;  %v4947_v50 = vld [vmem:[#allocation9 + $0x568] ss:$16 sps:$4 sm:$0xff]  }
  0xfd   :  { %1487 = vmatprep.subr.bf16.mxu1 %v4898_v52  ;;  %v4950_v52 = vld [vmem:[#allocation9 + $0x588] ss:$16 sps:$4 sm:$0xff]  }
  0xfe   :  { %1982 = vmatpush1.bf16.msra.mxu0 %v4989_v12 }
  0xff   :  { %1983 = vmatprep.subr.bf16.mxu0 %v4994_v14 }
 0x100   :  { %1488 = vmatpush1.bf16.msra.mxu1 %v4896_v54  ;;  %v4953_v54 = vld [vmem:[#allocation9 + $0x5a8] ss:$16 sps:$4 sm:$0xff]  }
 0x101   :  { %1489 = vmatprep.subr.bf16.mxu1 %v4901_v56  ;;  %v4956_v56 = vld [vmem:[#allocation9 + $0x5c8] ss:$16 sps:$4 sm:$0xff]  }
 0x102   :  { %1984 = vmatpush1.bf16.msra.mxu0 %v4992_v19 }
 0x103   :  { %1985 = vmatprep.subr.bf16.mxu0 %v4997_v20  ;;  %v5010_v20 = vld [vmem:[#allocation8 + $0x100] ss:$8 sps:$4 sm:$0xff]  }
 0x104   :  { %1490 = vmatpush1.bf16.msra.mxu1 %v4899_v58  ;;  %v4959_v58 = vld [vmem:[#allocation9 + $0x5e8] ss:$16 sps:$4 sm:$0xff]  }
 0x105   :  { %1491 = vmatprep.subr.bf16.mxu1 %v4904_v60 }
 0x106   :  { %1986 = vmatpush1.bf16.msra.mxu0 %v4995_v23  ;;  %v5058_v23 = vld [vmem:[#allocation6 + $0x40] sm:$0xff]  }
 0x107   :  { %1987 = vmatprep.subr.bf16.mxu0 %v5000_v25  ;;  %v5059_v25 = vld [vmem:[#allocation6] sm:$0xff]  }
 0x108   :  { %1492 = vmatpush1.bf16.msra.mxu1 %v4902_v62 }
 0x109   :  { %1493 = vmatprep.subr.bf16.mxu1 %v4907_v0  ;;  %v5637_v0 = vld [vmem:[#allocation5] sm:$0xf] }
 0x10a   :  { %1988 = vmatpush1.bf16.msra.mxu0 %v4998_v28  ;;  %v330_v4 = vrot.slane %v5637_v0, %v5640_v1  ;;  %v5018_v28 = vld [vmem:[#allocation8 + $0x124] ss:$8 sps:$4 sm:$0xff]  }
 0x10b   :  { %1989 = vmatprep.subr.bf16.mxu0 %v5003_v29  ;;  %v5061_v29 = vld [vmem:[#allocation6 + $0x8] sm:$0xff]  }
 0x10c   :  { %1494 = vmatpush1.bf16.msra.mxu1 %v4905_v2  ;;  %v326_v2 = vrot.slane %v5637_v0, %v5635_v63 }
 0x10d   :  { %1495 = vmatprep.subr.bf16.mxu1 %v4910_v5 }
 0x110   :  { %1496 = vmatpush1.bf16.msra.mxu1 %v4908_v7  ;;  %v5646_v7 = vstv %s1549_s1 }
 0x111   :  { %1497 = vmatprep.subr.bf16.mxu1 %v4913_v9 }
 0x114   :  { %1498 = vmatpush1.bf16.msra.mxu1 %v4911_v11 }
 0x115   :  { %1508 = vmatprep.subr.bf16.mxu1 %v4916_v13 }
 0x117   :  { %1500 = vmatmul.mubr.bf16.vlgmr.msra.gmra.mrb[4].mxu1 %v5610_v18  ;;  %v5001_v18 = vld [vmem:[#allocation8 + $0xd0] ss:$8 sps:$4 sm:$0xff]  }
 0x118   :  { %1509 = vmatpush1.bf16.msra.mxu1 %v4914_v15  ;;  %1540 = vmatprep.mubr.bf16.mxu1 %v5621_v49  ;;  %v4931_v49 = vld [vmem:[#allocation9 + $0x4ac] ss:$16 sps:$4 sm:$0xff]  }
 0x119   :  { %1510 = vmatprep.subr.bf16.mxu1 %v4919_v17  ;;  %1990 = vmatpush1.bf16.msra.mxu0 %v5001_v18  ;;  %v5021_v18 = vld [vmem:[#allocation8 + $0x134] ss:$8 sps:$4 sm:$0xff]  }
 0x11a   :  { %1991 = vmatprep.subr.bf16.mxu0 %v5006_v36  ;;  %v5066_v36 = vld [vmem:[#allocation6 + $0x60] sm:$0xff]  }
 0x11c   :  { %1511 = vmatpush1.bf16.msra.mxu1 %v4917_v21 }
 0x11d   :  { %1512 = vmatprep.subr.bf16.mxu1 %v4922_v22  ;;  %1992 = vmatpush1.bf16.msra.mxu0 %v5004_v3  ;;  %v5015_v22 = vld [vmem:[#allocation8 + $0x114] ss:$8 sps:$4 sm:$0xff]  }
 0x11e   :  { %1993 = vmatprep.subr.bf16.mxu0 %v5009_v38  ;;  %v5027_v3 = vld [vmem:[#allocation8 + $0x154] ss:$8 sps:$4 sm:$0xff]   ;;  %v5068_v38 = vld [vmem:[#allocation6 + $0x68] sm:$0xff]  }
 0x120   :  { %1513 = vmatpush1.bf16.msra.mxu1 %v4920_v26  ;;  %v5060_v26 = vld [vmem:[#allocation6 + $0x48] sm:$0xff]  }
 0x121   :  { %1514 = vmatprep.subr.bf16.mxu1 %v4925_v27  ;;  %1994 = vmatpush1.bf16.msra.mxu0 %v5007_v40  ;;  %v5013_v27 = vld [vmem:[#allocation8 + $0x110] ss:$8 sps:$4 sm:$0xff]   ;;  %v5030_v40 = vld [vmem:[#allocation8 + $0x164] ss:$8 sps:$4 sm:$0xff]  }
 0x122   :  { %2004 = vmatprep.subr.bf16.mxu0 %v5012_v42  ;;  %v5028_v42 = vld [vmem:[#allocation8 + $0x160] ss:$8 sps:$4 sm:$0xff]  }
 0x124   :  { %1515 = vmatpush1.bf16.msra.mxu1 %v4923_v30  ;;  %v5062_v30 = vld [vmem:[#allocation6 + $0x50] sm:$0xff]  }
 0x125   :  { %1516 = vmatprep.subr.bf16.mxu1 %v4928_v31  ;;  %v5016_v31 = vld [vmem:[#allocation8 + $0x120] ss:$8 sps:$4 sm:$0xff]  }
 0x128   :  { %1517 = vmatpush1.bf16.msra.mxu1 %v4926_v32  ;;  %v5063_v32 = vld [vmem:[#allocation6 + $0x10] sm:$0xff]  }
 0x129   :  { %1518 = vmatprep.subr.bf16.mxu1 %v4931_v49  ;;  %v5064_v49 = vld [vmem:[#allocation6 + $0x58] sm:$0xff]  }
 0x12c   :  { %1519 = vmatpush1.bf16.msra.mxu1 %v4929_v33  ;;  %v5019_v33 = vld [vmem:[#allocation8 + $0x130] ss:$8 sps:$4 sm:$0xff]  }
 0x12d   :  { %1520 = vmatprep.subr.bf16.mxu1 %v4934_v34  ;;  %v5024_v34 = vld [vmem:[#allocation8 + $0x144] ss:$8 sps:$4 sm:$0xff]  }
 0x130   :  { %1521 = vmatpush1.bf16.msra.mxu1 %v4932_v35  ;;  %v5065_v35 = vld [vmem:[#allocation6 + $0x18] sm:$0xff]  }
 0x131   :  { %1522 = vmatprep.subr.bf16.mxu1 %v4937_v16  ;;  %v5022_v16 = vld [vmem:[#allocation8 + $0x140] ss:$8 sps:$4 sm:$0xff]  }
 0x134   :  { %1523 = vmatpush1.bf16.msra.mxu1 %v4935_v37  ;;  %v5067_v37 = vld [vmem:[#allocation6 + $0x20] sm:$0xff]  }
 0x135   :  { %1524 = vmatprep.subr.bf16.mxu1 %v4940_v39  ;;  %v5025_v39 = vld [vmem:[#allocation8 + $0x150] ss:$8 sps:$4 sm:$0xff]  }
 0x138   :  { %1525 = vmatpush1.bf16.msra.mxu1 %v4938_v41  ;;  %v5069_v41 = vld [vmem:[#allocation6 + $0x28] sm:$0xff]  }
 0x139   :  { %1526 = vmatprep.subr.bf16.mxu1 %v4943_v44  ;;  %v5033_v44 = vld [vmem:[#allocation8 + $0x174] ss:$8 sps:$4 sm:$0xff]  }
 0x13c   :  { %1527 = vmatpush1.bf16.msra.mxu1 %v4941_v45  ;;  %v5031_v45 = vld [vmem:[#allocation8 + $0x170] ss:$8 sps:$4 sm:$0xff]  }
 0x13d   :  { %1528 = vmatprep.subr.bf16.mxu1 %v4946_v46  ;;  %v5036_v46 = vld [vmem:[#allocation8 + $0x184] ss:$8 sps:$4 sm:$0xff]  }
 0x140   :  { %1529 = vmatpush1.bf16.msra.mxu1 %v4944_v47  ;;  %v5034_v47 = vld [vmem:[#allocation8 + $0x180] ss:$8 sps:$4 sm:$0xff]  }
 0x141   :  { %1530 = vmatprep.subr.bf16.mxu1 %v4949_v48  ;;  %v5039_v48 = vld [vmem:[#allocation8 + $0x194] ss:$8 sps:$4 sm:$0xff]  }
 0x144   :  { %1531 = vmatpush1.bf16.msra.mxu1 %v4947_v50  ;;  %v5037_v50 = vld [vmem:[#allocation8 + $0x190] ss:$8 sps:$4 sm:$0xff]  }
 0x145   :  { %1532 = vmatprep.subr.bf16.mxu1 %v4952_v51  ;;  %v5042_v51 = vld [vmem:[#allocation8 + $0x1a4] ss:$8 sps:$4 sm:$0xff]  }
 0x148   :  { %1533 = vmatpush1.bf16.msra.mxu1 %v4950_v52  ;;  %v5040_v52 = vld [vmem:[#allocation8 + $0x1a0] ss:$8 sps:$4 sm:$0xff]  }
 0x149   :  { %1534 = vmatprep.subr.bf16.mxu1 %v4955_v53  ;;  %v5045_v53 = vld [vmem:[#allocation8 + $0x1b4] ss:$8 sps:$4 sm:$0xff]  }
 0x14c   :  { %1535 = vmatpush1.bf16.msra.mxu1 %v4953_v54  ;;  %v5043_v54 = vld [vmem:[#allocation8 + $0x1b0] ss:$8 sps:$4 sm:$0xff]  }
 0x14d   :  { %1536 = vmatprep.subr.bf16.mxu1 %v4958_v55  ;;  %v5048_v55 = vld [vmem:[#allocation8 + $0x1c4] ss:$8 sps:$4 sm:$0xff]  }
 0x150   :  { %1537 = vmatpush1.bf16.msra.mxu1 %v4956_v56  ;;  %v5046_v56 = vld [vmem:[#allocation8 + $0x1c0] ss:$8 sps:$4 sm:$0xff]  }
 0x151   :  { %1538 = vmatprep.subr.bf16.mxu1 %v4961_v57  ;;  %v5051_v57 = vld [vmem:[#allocation8 + $0x1d4] ss:$8 sps:$4 sm:$0xff]  }
 0x154   :  { %1539 = vmatpush1.bf16.msra.mxu1 %v4959_v58  ;;  %v5049_v58 = vld [vmem:[#allocation8 + $0x1d0] ss:$8 sps:$4 sm:$0xff]  }
 0x155   :  { %4564 = vmatprep.subr.bf16.mxu1 %v5058_v23  ;;  %v5076_v23 = vld [vmem:[#allocation9 + $0x604] ss:$16 sps:$4 sm:$0xff]  }
 0x157   :  { %1541 = vmatmul.mubr.bf16.vlgmr.msra.gmra.mrb[4].mxu1 %v5626_v24 }
 0x158   :  { %4565 = vmatpush3.bf16.msra.mxu1 %v5059_v25  ;;  %v1631_v25 = vld [vmem:[#allocation5 + $0x4] sm:$0x3] }
 0x159   :  { %4566 = vmatprep.subr.bf16.mxu1 %v5060_v26  ;;  %v1640_v26 = vrot.slane %v1631_v25, %v5640_v1 }
 0x15c   :  { %4567 = vmatpush3.bf16.msra.mxu1 %v5061_v29 }
 0x15d   :  { %4568 = vmatprep.subr.bf16.mxu1 %v5062_v30 }
 0x160   :  { %4569 = vmatpush3.bf16.msra.mxu1 %v5063_v32 }
 0x161   :  { %4570 = vmatprep.subr.bf16.mxu1 %v5064_v49 }
 0x164   :  { %4571 = vmatpush3.bf16.msra.mxu1 %v5065_v35 }
 0x165   :  { %4572 = vmatprep.subr.bf16.mxu1 %v5066_v36 }
 0x168   :  { %4573 = vmatpush3.bf16.msra.mxu1 %v5067_v37  ;;  %v5079_v37 = vld [vmem:[#allocation9 + $0x624] ss:$16 sps:$4 sm:$0xff]  }
 0x169   :  { %4574 = vmatprep.subr.bf16.mxu1 %v5068_v38  ;;  %v5077_v38 = vld [vmem:[#allocation9 + $0x620] ss:$16 sps:$4 sm:$0xff]  }
 0x16a   :  { %v1337_v59 = vpop.f32.mrb[0].mxu1 }
 0x16b   :  { %v1339_v60 = vpop.f32.mrb[1].mxu1  ;;  %v1338_v24 = vadd.f32 %v1337_v59, %v326_v2  ;;  %v5054_v59 = vld [vmem:[#allocation8 + $0x1e4] ss:$8 sps:$4 sm:$0xff]   ;;  %v5651_v2 = vsub.s32 2, %v5599_v43 }
 0x16c   :  { %v1341_v61 = vpop.f32.mrb[2].mxu1  ;;  %v1340_v5 = vadd.f32 %v1339_v60, %v330_v4  ;;  %4575 = vmatpush3.bf16.msra.mxu1 %v5069_v41  ;;  %v5052_v60 = vld [vmem:[#allocation8 + $0x1e0] ss:$8 sps:$4 sm:$0xff]   ;;  %v5654_v4 = vsub.s32 3, %v5599_v43  ;;  %v5085_v41 = vld [vmem:[#allocation9 + $0x664] ss:$16 sps:$4 sm:$0xff]  }
 0x16d   :  { %v1342_v62 = vpop.f32.mrb[3].mxu1  ;;  %v5057_v61 = vld [vmem:[#allocation8 + $0x1f4] ss:$8 sps:$4 sm:$0xff]  }
 0x16e   :  { %v5055_v62 = vld [vmem:[#allocation8 + $0x1f0] ss:$8 sps:$4 sm:$0xff]  }
 0x1ab   :  { %v1419_v6 = vpop.f32.mrb[0].mxu0 }
 0x1ac   :  { %v4631_v8 = vadd.f32 %v1419_v6, %v1338_v24  ;;  %v1421_v9 = vpop.f32.mrb[1].mxu0  ;;  %v334_v24 = vrot.slane %v5637_v0, %v5651_v2 }
 0x1ad   :  { %v4633_v10 = vadd.f32 %v1421_v9, %v1340_v5  ;;  %v1423_v11 = vpop.f32.mrb[2].mxu0  ;;  %v338_v5 = vrot.slane %v5637_v0, %v5654_v4  ;;  %v5071_v0 = vld [vmem:[#allocation6 + $0x30] sm:$0xff]  }
 0x1ae   :  { %vm1550_vm0 = vcmp.ge.f32.partialorder %v4631_v8, 0.0  ;;  %v1555_v12 = vmul.f32 %v4631_v8, %v5646_v7  ;;  %v1424_v13 = vpop.f32.mrb[3].mxu0 }
 0x1af   :  { %vm1551_vm1 = vcmp.ge.f32.partialorder %v4633_v10, 0.0  ;;  %v1556_v14 = vmul.f32 %v4633_v10, %v5646_v7 }
 0x1b0   :  { %v1559_v15 = vsel %vm1550_vm0, %v4631_v8, %v1555_v12 }
 0x1b1   :  { %v1560_v17 = vsel %vm1551_vm1, %v4633_v10, %v1556_v14  ;;  %v1563_v21 = vpack.c.bf16 %v1559_v15, %v1559_v15 }
 0x1b2   :  { %v1564_v19 = vpack.c.bf16 %v1560_v17, %v1560_v17 }
 0x1b4   :  { %1995 = vmatprep.mubr.bf16.mxu0 %v1564_v19 }
 0x1b5   :  { %1996 = vmatmul.mubr.bf16.vlgmr.msra.gmra.mrb[4].mxu0 %v1563_v21  ;;  %v5072_v21 = vld [vmem:[#allocation6 + $0x78] sm:$0xff]  }
 0x1b6   :  { %2005 = vmatpush1.bf16.msra.mxu0 %v5010_v20  ;;  %v5070_v20 = vld [vmem:[#allocation6 + $0x70] sm:$0xff]  }
 0x1b7   :  { %2006 = vmatprep.subr.bf16.mxu0 %v5015_v22  ;;  %4576 = vmatprep.subr.bf16.mxu1 %v5070_v20  ;;  %v5073_v22 = vld [vmem:[#allocation6 + $0x38] sm:$0xff]  }
 0x1b8   :  { %4577 = vmatpush3.bf16.msra.mxu1 %v5071_v0  ;;  %v5118_v20 = vld [vmem:[#allocation9 + $0x6cc] ss:$16 sps:$4 sm:$0xff]   ;;  %v5116_v0 = vld [vmem:[#allocation9 + $0x6c8] ss:$16 sps:$4 sm:$0xff]  }
 0x1b9   :  { %4578 = vmatprep.subr.bf16.mxu1 %v5072_v21  ;;  %v5121_v21 = vld [vmem:[#allocation9 + $0x6ec] ss:$16 sps:$4 sm:$0xff]  }
 0x1ba   :  { %2007 = vmatpush1.bf16.msra.mxu0 %v5013_v27 }
 0x1bb   :  { %2008 = vmatprep.subr.bf16.mxu0 %v5018_v28  ;;  %v2048_v28 = vstv %s4331_s10 }
 0x1bc   :  { %4579 = vmatpush3.bf16.msra.mxu1 %v5073_v22  ;;  %v5119_v22 = vld [vmem:[#allocation9 + $0x6e8] ss:$16 sps:$4 sm:$0xff]  }
 0x1bd   :  { %2450 = vmatprep.subr.bf16.mxu1 %v5076_v23  ;;  %v5122_v23 = vld [vmem:[#allocation6 + $0xc0] sm:$0xff]  }
 0x1be   :  { %2009 = vmatpush1.bf16.msra.mxu0 %v5016_v31 }
 0x1bf   :  { %2010 = vmatprep.subr.bf16.mxu0 %v5021_v18 }
 0x1c2   :  { %2011 = vmatpush1.bf16.msra.mxu0 %v5019_v33 }
 0x1c3   :  { %2012 = vmatprep.subr.bf16.mxu0 %v5024_v34 }
 0x1c6   :  { %2013 = vmatpush1.bf16.msra.mxu0 %v5022_v16  ;;  %v5074_v16 = vld [vmem:[#allocation9 + $0x600] ss:$16 sps:$4 sm:$0xff]  }
 0x1c7   :  { %2014 = vmatprep.subr.bf16.mxu0 %v5027_v3 }
 0x1ca   :  { %2015 = vmatpush1.bf16.msra.mxu0 %v5025_v39  ;;  %v5082_v39 = vld [vmem:[#allocation9 + $0x644] ss:$16 sps:$4 sm:$0xff]  }
 0x1cb   :  { %2016 = vmatprep.subr.bf16.mxu0 %v5030_v40  ;;  %v5080_v40 = vld [vmem:[#allocation9 + $0x640] ss:$16 sps:$4 sm:$0xff]  }
 0x1ce   :  { %2017 = vmatpush1.bf16.msra.mxu0 %v5028_v42  ;;  %v5083_v42 = vld [vmem:[#allocation9 + $0x660] ss:$16 sps:$4 sm:$0xff]  }
 0x1cf   :  { %2018 = vmatprep.subr.bf16.mxu0 %v5033_v44  ;;  %v5088_v44 = vld [vmem:[#allocation9 + $0x684] ss:$16 sps:$4 sm:$0xff]  }
 0x1d2   :  { %2019 = vmatpush1.bf16.msra.mxu0 %v5031_v45  ;;  %v5086_v45 = vld [vmem:[#allocation9 + $0x680] ss:$16 sps:$4 sm:$0xff]  }
 0x1d3   :  { %2020 = vmatprep.subr.bf16.mxu0 %v5036_v46  ;;  %v5091_v46 = vld [vmem:[#allocation9 + $0x6a4] ss:$16 sps:$4 sm:$0xff]  }
 0x1d6   :  { %2021 = vmatpush1.bf16.msra.mxu0 %v5034_v47  ;;  %v5089_v47 = vld [vmem:[#allocation9 + $0x6a0] ss:$16 sps:$4 sm:$0xff]  }
 0x1d7   :  { %2022 = vmatprep.subr.bf16.mxu0 %v5039_v48  ;;  %v5094_v48 = vld [vmem:[#allocation9 + $0x6c4] ss:$16 sps:$4 sm:$0xff]  }
 0x1da   :  { %2023 = vmatpush1.bf16.msra.mxu0 %v5037_v50  ;;  %v5092_v50 = vld [vmem:[#allocation9 + $0x6c0] ss:$16 sps:$4 sm:$0xff]  }
 0x1db   :  { %2024 = vmatprep.subr.bf16.mxu0 %v5042_v51  ;;  %v5097_v51 = vld [vmem:[#allocation9 + $0x6e4] ss:$16 sps:$4 sm:$0xff]  }
 0x1de   :  { %2025 = vmatpush1.bf16.msra.mxu0 %v5040_v52  ;;  %v5095_v52 = vld [vmem:[#allocation9 + $0x6e0] ss:$16 sps:$4 sm:$0xff]  }
 0x1df   :  { %2026 = vmatprep.subr.bf16.mxu0 %v5045_v53  ;;  %v5100_v53 = vld [vmem:[#allocation9 + $0x60c] ss:$16 sps:$4 sm:$0xff]  }
 0x1e2   :  { %2027 = vmatpush1.bf16.msra.mxu0 %v5043_v54  ;;  %v5496_v54 = vmov 0  }
 0x1e3   :  { %2028 = vmatprep.subr.bf16.mxu0 %v5048_v55 }
 0x1e6   :  { %2029 = vmatpush1.bf16.msra.mxu0 %v5046_v56  ;;  %v4332_v56 = vld [vmem:[#allocation5 + $0x6] ss:$0 sm:$0xff] }
 0x1e7   :  { %2030 = vmatprep.subr.bf16.mxu0 %v5051_v57 }
 0x1ea   :  { %2031 = vmatpush1.bf16.msra.mxu0 %v5049_v58 }
 0x1eb   :  { %2032 = vmatprep.subr.bf16.mxu0 %v5054_v59 }
 0x1ee   :  { %2033 = vmatpush1.bf16.msra.mxu0 %v5052_v60  ;;  %v2232_v60 = vstv %s4349_s11 }
 0x1ef   :  { %2034 = vmatprep.subr.bf16.mxu0 %v5057_v61 }
 0x1f2   :  { %2035 = vmatpush1.bf16.msra.mxu0 %v5055_v62 }
 0x22a   :  { %v1542_v6 = vpop.f32.mrb[4].mxu1 }
 0x22b   :  { %v4634_v8 = vadd.f32 %v1542_v6, %v334_v24  ;;  %v1544_v9 = vpop.f32.mrb[5].mxu1  ;;  %v5098_v6 = vld [vmem:[#allocation9 + $0x608] ss:$16 sps:$4 sm:$0xff]  }
 0x22c   :  { %v4635_v10 = vadd.f32 %v1544_v9, %v338_v5  ;;  %v1546_v11 = vpop.f32.mrb[6].mxu1  ;;  %v5103_v9 = vld [vmem:[#allocation9 + $0x62c] ss:$16 sps:$4 sm:$0xff]  }
 0x22d   :  { %vm1552_vm2 = vcmp.ge.f32.partialorder %v4634_v8, 0.0  ;;  %v1557_v12 = vmul.f32 %v4634_v8, %v5646_v7  ;;  %v1547_v13 = vpop.f32.mrb[7].mxu1  ;;  %v5106_v11 = vld [vmem:[#allocation9 + $0x64c] ss:$16 sps:$4 sm:$0xff]  }
 0x22e   :  { %vm1553_vm3 = vcmp.ge.f32.partialorder %v4635_v10, 0.0  ;;  %v1558_v14 = vmul.f32 %v4635_v10, %v5646_v7  ;;  %v1636_v7 = vrot.slane %v1631_v25, %v5635_v63  ;;  %v5109_v13 = vld [vmem:[#allocation9 + $0x66c] ss:$16 sps:$4 sm:$0xff]   ;;  %v5123_v25 = vld [vmem:[#allocation6 + $0x80] sm:$0xff]  }
 0x22f   :  { %v1561_v43 = vsel %vm1552_vm2, %v4634_v8, %v1557_v12  ;;  %v5104_v12 = vld [vmem:[#allocation9 + $0x648] ss:$16 sps:$4 sm:$0xff]  }
 0x230   :  { %v1562_v15 = vsel %vm1553_vm3, %v4635_v10, %v1558_v14  ;;  %v1565_v19 = vpack.c.bf16 %v1561_v43, %v1561_v43  ;;  %v5101_v10 = vld [vmem:[#allocation9 + $0x628] ss:$16 sps:$4 sm:$0xff]   ;;  %v5112_v43 = vld [vmem:[#allocation9 + $0x68c] ss:$16 sps:$4 sm:$0xff]  }
 0x231   :  { %v1566_v17 = vpack.c.bf16 %v1562_v15, %v1562_v15  ;;  %v5107_v14 = vld [vmem:[#allocation9 + $0x668] ss:$16 sps:$4 sm:$0xff]  }
 0x232   :  { %v5110_v15 = vld [vmem:[#allocation9 + $0x688] ss:$16 sps:$4 sm:$0xff]  }
 0x233   :  { %2036 = vmatprep.mubr.bf16.mxu0 %v1566_v17  ;;  %v5115_v17 = vld [vmem:[#allocation9 + $0x6ac] ss:$16 sps:$4 sm:$0xff]  }
 0x234   :  { %2037 = vmatmul.mubr.bf16.vlgmr.msra.gmra.mrb[4].mxu0 %v1565_v19  ;;  %v5113_v19 = vld [vmem:[#allocation9 + $0x6a8] ss:$16 sps:$4 sm:$0xff]  }
 0x307   :  { %v2038_v27 = vpop.f32.mrb[4].mxu0 }
 0x308   :  { %v4636_v29 = vadd.f32 %v2038_v27, %v1636_v7  ;;  %v2040_v30 = vpop.f32.mrb[5].mxu0  ;;  %v5124_v7 = vld [vmem:[#allocation6 + $0xc8] sm:$0xff]   ;;  %v5126_v27 = vld [vmem:[#allocation6 + $0xd0] sm:$0xff]  }
 0x309   :  { %v4637_v31 = vadd.f32 %v2040_v30, %v1640_v26  ;;  %v2042_v18 = vpop.f32.mrb[6].mxu0  ;;  %v5125_v26 = vld [vmem:[#allocation6 + $0x88] sm:$0xff]   ;;  %v5129_v30 = vld [vmem:[#allocation6 + $0x98] sm:$0xff]  }
 0x30a   :  { %vm2046_vm4 = vcmp.ge.f32.partialorder %v4636_v29, 0.0  ;;  %v2049_v32 = vmul.f32 %v4636_v29, %v2048_v28  ;;  %v2043_v49 = vpop.f32.mrb[7].mxu0  ;;  %v5131_v18 = vld [vmem:[#allocation6 + $0xa0] sm:$0xff]  }
 0x30b   :  { %vm2047_vm5 = vcmp.ge.f32.partialorder %v4637_v31, 0.0  ;;  %v2050_v33 = vmul.f32 %v4637_v31, %v2048_v28  ;;  %v5127_v28 = vld [vmem:[#allocation6 + $0x90] sm:$0xff]   ;;  %v5133_v49 = vld [vmem:[#allocation6 + $0xa8] sm:$0xff]  }
 0x30c   :  { %v2051_v34 = vsel %vm2046_vm4, %v4636_v29, %v2049_v32  ;;  %v5128_v29 = vld [vmem:[#allocation6 + $0xd8] sm:$0xff]   ;;  %v5132_v32 = vld [vmem:[#allocation6 + $0xe8] sm:$0xff]  }
 0x30d   :  { %v2052_v35 = vsel %vm2047_vm5, %v4637_v31, %v2050_v33  ;;  %v2053_v3 = vpack.c.bf16 %v2051_v34, %v2051_v34  ;;  %v5130_v31 = vld [vmem:[#allocation6 + $0xe0] sm:$0xff]   ;;  %v5134_v33 = vld [vmem:[#allocation6 + $0xf0] sm:$0xff]  }
 0x30e   :  { %v2054_v36 = vpack.c.bf16 %v2052_v35, %v2052_v35  ;;  %v5135_v34 = vld [vmem:[#allocation6 + $0xb0] sm:$0xff]   ;;  %v5136_v35 = vld [vmem:[#allocation6 + $0xf8] sm:$0xff]  }
 0x310   :  { %2222 = vmatprep.mubr.bf16.mxu1 %v2054_v36  ;;  %v5137_v36 = vld [vmem:[#allocation6 + $0xb8] sm:$0xff]  }
 0x311   :  { %2223 = vmatmul.mubr.bf16.vlgmr.msra.gmra.mrb[8].mxu1 %v2053_v3  ;;  %v5139_v3 = vld [vmem:[#allocation6 + $0x100] sm:$0xff]  }
 0x312   :  { %2451 = vmatpush1.bf16.msra.mxu1 %v5074_v16  ;;  %2482 = vmatprep.mubr.bf16.mxu1 %v5496_v54  ;;  %v5138_v16 = vld [vmem:[#allocation6 + $0x140] sm:$0xff]  }
 0x313   :  { %2452 = vmatprep.subr.bf16.mxu1 %v5079_v37  ;;  %4608 = vmatprep.subr.bf16.mxu0 %v5138_v16  ;;  %v5140_v37 = vld [vmem:[#allocation6 + $0x148] sm:$0xff]   ;;  %v5177_v16 = vld [vmem:[#allocation8 + $0x274] ss:$8 sps:$4 sm:$0xff]  }
 0x314   :  { %4609 = vmatpush3.bf16.msra.mxu0 %v5139_v3  ;;  %v5175_v3 = vld [vmem:[#allocation8 + $0x270] ss:$8 sps:$4 sm:$0xff]  }
 0x315   :  { %4610 = vmatprep.subr.bf16.mxu0 %v5140_v37  ;;  %v5178_v37 = vld [vmem:[#allocation9 + $0x700] ss:$16 sps:$4 sm:$0xff]  }
 0x316   :  { %2453 = vmatpush1.bf16.msra.mxu1 %v5077_v38  ;;  %v5141_v38 = vld [vmem:[#allocation6 + $0x108] sm:$0xff]  }
 0x317   :  { %2454 = vmatprep.subr.bf16.mxu1 %v5082_v39  ;;  %v5142_v39 = vld [vmem:[#allocation6 + $0x150] sm:$0xff]  }
 0x318   :  { %4611 = vmatpush3.bf16.msra.mxu0 %v5141_v38  ;;  %v5180_v38 = vld [vmem:[#allocation9 + $0x704] ss:$16 sps:$4 sm:$0xff]  }
 0x319   :  { %4612 = vmatprep.subr.bf16.mxu0 %v5142_v39  ;;  %v5183_v39 = vld [vmem:[#allocation9 + $0x70c] ss:$16 sps:$4 sm:$0xff]  }
 0x31a   :  { %2455 = vmatpush1.bf16.msra.mxu1 %v5080_v40  ;;  %v5143_v40 = vld [vmem:[#allocation6 + $0x110] sm:$0xff]  }
 0x31b   :  { %2456 = vmatprep.subr.bf16.mxu1 %v5085_v41  ;;  %v5144_v41 = vld [vmem:[#allocation6 + $0x158] sm:$0xff]  }
 0x31c   :  { %4613 = vmatpush3.bf16.msra.mxu0 %v5143_v40  ;;  %v5186_v40 = vld [vmem:[#allocation9 + $0x724] ss:$16 sps:$4 sm:$0xff]  }
 0x31d   :  { %4614 = vmatprep.subr.bf16.mxu0 %v5144_v41  ;;  %v5184_v41 = vld [vmem:[#allocation9 + $0x720] ss:$16 sps:$4 sm:$0xff]  }
 0x31e   :  { %2457 = vmatpush1.bf16.msra.mxu1 %v5083_v42  ;;  %v5145_v42 = vld [vmem:[#allocation6 + $0x118] sm:$0xff]  }
 0x31f   :  { %2458 = vmatprep.subr.bf16.mxu1 %v5088_v44  ;;  %v5146_v44 = vld [vmem:[#allocation6 + $0x160] sm:$0xff]  }
 0x320   :  { %4615 = vmatpush3.bf16.msra.mxu0 %v5145_v42  ;;  %v5192_v42 = vld [vmem:[#allocation9 + $0x744] ss:$16 sps:$4 sm:$0xff]  }
 0x321   :  { %4616 = vmatprep.subr.bf16.mxu0 %v5146_v44  ;;  %v5190_v44 = vld [vmem:[#allocation9 + $0x740] ss:$16 sps:$4 sm:$0xff]  }
 0x322   :  { %2459 = vmatpush1.bf16.msra.mxu1 %v5086_v45  ;;  %v5147_v45 = vld [vmem:[#allocation6 + $0x120] sm:$0xff]  }
 0x323   :  { %2460 = vmatprep.subr.bf16.mxu1 %v5091_v46  ;;  %v5148_v46 = vld [vmem:[#allocation6 + $0x168] sm:$0xff]  }
 0x324   :  { %4617 = vmatpush3.bf16.msra.mxu0 %v5147_v45  ;;  %v5198_v45 = vld [vmem:[#allocation9 + $0x764] ss:$16 sps:$4 sm:$0xff]  }
 0x325   :  { %4618 = vmatprep.subr.bf16.mxu0 %v5148_v46  ;;  %v5196_v46 = vld [vmem:[#allocation9 + $0x760] ss:$16 sps:$4 sm:$0xff]  }
 0x326   :  { %2461 = vmatpush1.bf16.msra.mxu1 %v5089_v47  ;;  %v5149_v47 = vld [vmem:[#allocation6 + $0x128] sm:$0xff]  }
 0x327   :  { %2462 = vmatprep.subr.bf16.mxu1 %v5094_v48  ;;  %v5150_v48 = vld [vmem:[#allocation6 + $0x170] sm:$0xff]  }
 0x328   :  { %4619 = vmatpush3.bf16.msra.mxu0 %v5149_v47  ;;  %v5204_v47 = vld [vmem:[#allocation9 + $0x784] ss:$16 sps:$4 sm:$0xff]  }
 0x329   :  { %4620 = vmatprep.subr.bf16.mxu0 %v5150_v48  ;;  %v5202_v48 = vld [vmem:[#allocation9 + $0x780] ss:$16 sps:$4 sm:$0xff]  }
 0x32a   :  { %2463 = vmatpush1.bf16.msra.mxu1 %v5092_v50  ;;  %v5151_v50 = vld [vmem:[#allocation6 + $0x130] sm:$0xff]  }
 0x32b   :  { %2464 = vmatprep.subr.bf16.mxu1 %v5097_v51  ;;  %v5152_v51 = vld [vmem:[#allocation6 + $0x178] sm:$0xff]  }
 0x32c   :  { %4621 = vmatpush3.bf16.msra.mxu0 %v5151_v50  ;;  %v5210_v50 = vld [vmem:[#allocation9 + $0x7a4] ss:$16 sps:$4 sm:$0xff]  }
 0x32d   :  { %4622 = vmatprep.subr.bf16.mxu0 %v5152_v51  ;;  %v5208_v51 = vld [vmem:[#allocation9 + $0x7a0] ss:$16 sps:$4 sm:$0xff]  }
 0x32e   :  { %2465 = vmatpush1.bf16.msra.mxu1 %v5095_v52  ;;  %v5153_v52 = vld [vmem:[#allocation6 + $0x138] sm:$0xff]  }
 0x32f   :  { %2491 = vmatprep.subr.bf16.mxu1 %v5100_v53  ;;  %v2268_v53 = vld [vmem:[#allocation5 + $0x7] sm:$0xf] }
 0x330   :  { %4623 = vmatpush3.bf16.msra.mxu0 %v5153_v52  ;;  %v5216_v52 = vld [vmem:[#allocation9 + $0x7c4] ss:$16 sps:$4 sm:$0xff]  }
 0x331   :  { %3464 = vmatprep.subr.bf16.mxu0 %v5180_v38  ;;  %v5231_v38 = vld [vmem:[#allocation9 + $0x80c] ss:$16 sps:$4 sm:$0xff]  }
 0x3e4   :  { %v4580_v55 = vpop.f32.mrb[8].mxu1 }
 0x3e5   :  { %v4581_v57 = vpop.f32.mrb[9].mxu1 }
 0x3e6   :  { %v4582_v58 = vadd.f32 %v4581_v57, %v4580_v55  ;;  %v4583_v59 = vpop.f32.mrb[10].mxu1  ;;  %v2273_v55 = vrot.slane %v2268_v53, %v5635_v63 }
 0x3e7   :  { %v4584_v61 = vpop.f32.mrb[11].mxu1 }
 0x3e8   :  { %v2225_v62 = vadd.f32 %v4582_v58, %v4332_v56  ;;  %v2277_v56 = vrot.slane %v2268_v53, %v5640_v1  ;;  %v2537_v58 = vstv %s4382_s12 }
 0x3ea   :  { %vm2231_vm6 = vcmp.ge.f32.partialorder %v2225_v62, 0.0  ;;  %v2233_v24 = vmul.f32 %v2232_v60, %v2225_v62 }
 0x3ec   :  { %v2234_v5 = vsel %vm2231_vm6, %v2225_v62, %v2233_v24 }
 0x3ed   :  { %v2235_v8 = vpack.c.bf16 %v2234_v5, %v2234_v5 }
 0x3ef   :  { %2483 = vmatmul.mubr.bf16.vlgmr.msra.gmra.mrb[12].mxu1 %v2235_v8 }
 0x3f0   :  { %2492 = vmatpush1.bf16.msra.mxu1 %v5098_v6  ;;  %2523 = vmatprep.mubr.bf16.mxu1 %v5496_v54 }
 0x3f1   :  { %2493 = vmatprep.subr.bf16.mxu1 %v5103_v9 }
 0x3f4   :  { %2494 = vmatpush1.bf16.msra.mxu1 %v5101_v10 }
 0x3f5   :  { %2495 = vmatprep.subr.bf16.mxu1 %v5106_v11 }
 0x3f8   :  { %2496 = vmatpush1.bf16.msra.mxu1 %v5104_v12  ;;  %v2281_v12 = vrot.slane %v2268_v53, %v5651_v2 }
 0x3f9   :  { %2497 = vmatprep.subr.bf16.mxu1 %v5109_v13  ;;  %v2285_v13 = vrot.slane %v2268_v53, %v5654_v4  ;;  %v5214_v53 = vld [vmem:[#allocation9 + $0x7c0] ss:$16 sps:$4 sm:$0xff]  }
 0x3fc   :  { %2498 = vmatpush1.bf16.msra.mxu1 %v5107_v14 }
 0x3fd   :  { %2499 = vmatprep.subr.bf16.mxu1 %v5112_v43 }
 0x400   :  { %2500 = vmatpush1.bf16.msra.mxu1 %v5110_v15 }
 0x401   :  { %2501 = vmatprep.subr.bf16.mxu1 %v5115_v17 }
 0x404   :  { %2502 = vmatpush1.bf16.msra.mxu1 %v5113_v19 }
 0x405   :  { %2503 = vmatprep.subr.bf16.mxu1 %v5118_v20 }
 0x408   :  { %2504 = vmatpush1.bf16.msra.mxu1 %v5116_v0 }
 0x409   :  { %2505 = vmatprep.subr.bf16.mxu1 %v5121_v21 }
 0x40c   :  { %2506 = vmatpush1.bf16.msra.mxu1 %v5119_v22 }
 0x40d   :  { %4586 = vmatprep.subr.bf16.mxu1 %v5122_v23 }
 0x40f   :  { %2524 = vmatmul.mubr.bf16.vlgmr.msra.gmra.mrb[16].mxu1 %v2235_v8 }
 0x410   :  { %4587 = vmatpush3.bf16.msra.mxu1 %v5123_v25 }
 0x411   :  { %4588 = vmatprep.subr.bf16.mxu1 %v5124_v7 }
 0x414   :  { %4589 = vmatpush3.bf16.msra.mxu1 %v5125_v26  ;;  %v5156_v26 = vld [vmem:[#allocation8 + $0x204] ss:$8 sps:$4 sm:$0xff]  }
 0x415   :  { %4590 = vmatprep.subr.bf16.mxu1 %v5126_v27  ;;  %v5159_v27 = vld [vmem:[#allocation8 + $0x214] ss:$8 sps:$4 sm:$0xff]  }
 0x418   :  { %4591 = vmatpush3.bf16.msra.mxu1 %v5127_v28  ;;  %v5157_v28 = vld [vmem:[#allocation8 + $0x210] ss:$8 sps:$4 sm:$0xff]  }
 0x419   :  { %4592 = vmatprep.subr.bf16.mxu1 %v5128_v29  ;;  %v5162_v29 = vld [vmem:[#allocation8 + $0x224] ss:$8 sps:$4 sm:$0xff]  }
 0x41c   :  { %4593 = vmatpush3.bf16.msra.mxu1 %v5129_v30  ;;  %v5160_v30 = vld [vmem:[#allocation8 + $0x220] ss:$8 sps:$4 sm:$0xff]  }
 0x41d   :  { %4594 = vmatprep.subr.bf16.mxu1 %v5130_v31  ;;  %v5165_v31 = vld [vmem:[#allocation8 + $0x234] ss:$8 sps:$4 sm:$0xff]  }
 0x420   :  { %4595 = vmatpush3.bf16.msra.mxu1 %v5131_v18  ;;  %v5163_v18 = vld [vmem:[#allocation8 + $0x230] ss:$8 sps:$4 sm:$0xff]  }
 0x421   :  { %4596 = vmatprep.subr.bf16.mxu1 %v5132_v32  ;;  %v5168_v32 = vld [vmem:[#allocation8 + $0x244] ss:$8 sps:$4 sm:$0xff]  }
 0x424   :  { %4597 = vmatpush3.bf16.msra.mxu1 %v5133_v49  ;;  %v5166_v49 = vld [vmem:[#allocation8 + $0x240] ss:$8 sps:$4 sm:$0xff]  }
 0x425   :  { %4598 = vmatprep.subr.bf16.mxu1 %v5134_v33  ;;  %v5171_v33 = vld [vmem:[#allocation8 + $0x254] ss:$8 sps:$4 sm:$0xff]  }
 0x428   :  { %4599 = vmatpush3.bf16.msra.mxu1 %v5135_v34  ;;  %v5169_v34 = vld [vmem:[#allocation8 + $0x250] ss:$8 sps:$4 sm:$0xff]  }
 0x429   :  { %4600 = vmatprep.subr.bf16.mxu1 %v5136_v35  ;;  %v5174_v35 = vld [vmem:[#allocation8 + $0x264] ss:$8 sps:$4 sm:$0xff]  }
 0x42c   :  { %4601 = vmatpush3.bf16.msra.mxu1 %v5137_v36  ;;  %v5172_v36 = vld [vmem:[#allocation8 + $0x260] ss:$8 sps:$4 sm:$0xff]  }
 0x42d   :  { %3007 = vmatprep.subr.bf16.mxu1 %v5156_v26  ;;  %v5181_v26 = vld [vmem:[#allocation9 + $0x708] ss:$16 sps:$4 sm:$0xff]  }
 0x4c2   :  { %v2484_v57 = vpop.f32.mrb[12].mxu1 }
 0x4c3   :  { %v2485_v59 = vadd.f32 %v2484_v57, %v2273_v55  ;;  %v2486_v60 = vpop.f32.mrb[13].mxu1  ;;  %v5222_v55 = vld [vmem:[#allocation9 + $0x7e4] ss:$16 sps:$4 sm:$0xff]  }
 0x4c4   :  { %v2487_v61 = vadd.f32 %v2486_v60, %v2277_v56  ;;  %v2488_v62 = vpop.f32.mrb[14].mxu1  ;;  %v5220_v56 = vld [vmem:[#allocation9 + $0x7e0] ss:$16 sps:$4 sm:$0xff]   ;;  %v5228_v57 = vld [vmem:[#allocation9 + $0x804] ss:$16 sps:$4 sm:$0xff]  }
 0x4c5   :  { %vm2533_vm7 = vcmp.ge.f32.partialorder %v2485_v59, 0.0  ;;  %v2538_v24 = vmul.f32 %v2537_v58, %v2485_v59  ;;  %v2489_v5 = vpop.f32.mrb[15].mxu1  ;;  %v5232_v60 = vld [vmem:[#allocation9 + $0x820] ss:$16 sps:$4 sm:$0xff]  }
 0x4c6   :  { %vm2534_vm8 = vcmp.ge.f32.partialorder %v2487_v61, 0.0  ;;  %v2539_v6 = vmul.f32 %v2537_v58, %v2487_v61  ;;  %v5238_v62 = vld [vmem:[#allocation9 + $0x840] ss:$16 sps:$4 sm:$0xff]  }
 0x4c7   :  { %v2542_v8 = vsel %vm2533_vm7, %v2485_v59, %v2538_v24  ;;  %v5234_v59 = vld [vmem:[#allocation9 + $0x824] ss:$16 sps:$4 sm:$0xff]   ;;  %v5244_v5 = vld [vmem:[#allocation9 + $0x860] ss:$16 sps:$4 sm:$0xff]  }
 0x4c8   :  { %v2543_v9 = vsel %vm2534_vm8, %v2487_v61, %v2539_v6  ;;  %v2546_v11 = vpack.c.bf16 %v2542_v8, %v2542_v8  ;;  %v5240_v61 = vld [vmem:[#allocation9 + $0x844] ss:$16 sps:$4 sm:$0xff]   ;;  %v5250_v8 = vld [vmem:[#allocation9 + $0x880] ss:$16 sps:$4 sm:$0xff]  }
 0x4c9   :  { %v2547_v10 = vpack.c.bf16 %v2543_v9, %v2543_v9  ;;  %v5246_v24 = vld [vmem:[#allocation9 + $0x864] ss:$16 sps:$4 sm:$0xff]  }
 0x4ca   :  { %v5252_v6 = vld [vmem:[#allocation9 + $0x884] ss:$16 sps:$4 sm:$0xff]  }
 0x4cb   :  { %2845 = vmatprep.mubr.bf16.mxu1 %v2547_v10  ;;  %v5258_v9 = vld [vmem:[#allocation9 + $0x8a4] ss:$16 sps:$4 sm:$0xff]   ;;  %v5256_v10 = vld [vmem:[#allocation9 + $0x8a0] ss:$16 sps:$4 sm:$0xff]  }
 0x4cc   :  { %2846 = vmatmul.mubr.bf16.vlgmr.msra.gmra.mrb[20].mxu1 %v2546_v11 }
 0x4cd   :  { %3039 = vmatprep.mubr.bf16.mxu1 %v5496_v54  ;;  %v5154_v54 = vld [vmem:[#allocation8 + $0x200] ss:$8 sps:$4 sm:$0xff]  }
 0x4ce   :  { %3008 = vmatpush1.bf16.msra.mxu1 %v5154_v54 }
 0x4cf   :  { %3009 = vmatprep.subr.bf16.mxu1 %v5159_v27 }
 0x4d2   :  { %3010 = vmatpush1.bf16.msra.mxu1 %v5157_v28  ;;  %v5189_v28 = vld [vmem:[#allocation9 + $0x72c] ss:$16 sps:$4 sm:$0xff]  }
 0x4d3   :  { %3011 = vmatprep.subr.bf16.mxu1 %v5162_v29  ;;  %v5187_v29 = vld [vmem:[#allocation9 + $0x728] ss:$16 sps:$4 sm:$0xff]  }
 0x4d6   :  { %3012 = vmatpush1.bf16.msra.mxu1 %v5160_v30  ;;  %v5195_v30 = vld [vmem:[#allocation9 + $0x74c] ss:$16 sps:$4 sm:$0xff]  }
 0x4d7   :  { %3013 = vmatprep.subr.bf16.mxu1 %v5165_v31  ;;  %v5193_v31 = vld [vmem:[#allocation9 + $0x748] ss:$16 sps:$4 sm:$0xff]  }
 0x4da   :  { %3014 = vmatpush1.bf16.msra.mxu1 %v5163_v18  ;;  %v5201_v18 = vld [vmem:[#allocation9 + $0x76c] ss:$16 sps:$4 sm:$0xff]  }
 0x4db   :  { %3015 = vmatprep.subr.bf16.mxu1 %v5168_v32  ;;  %v5199_v32 = vld [vmem:[#allocation9 + $0x768] ss:$16 sps:$4 sm:$0xff]  }
 0x4de   :  { %3016 = vmatpush1.bf16.msra.mxu1 %v5166_v49  ;;  %v5207_v49 = vld [vmem:[#allocation9 + $0x78c] ss:$16 sps:$4 sm:$0xff]  }
 0x4df   :  { %3017 = vmatprep.subr.bf16.mxu1 %v5171_v33  ;;  %v5205_v33 = vld [vmem:[#allocation9 + $0x788] ss:$16 sps:$4 sm:$0xff]  }
 0x4e2   :  { %v2525_v14 = vpop.f32.mrb[16].mxu1  ;;  %3018 = vmatpush1.bf16.msra.mxu1 %v5169_v34  ;;  %v5213_v34 = vld [vmem:[#allocation9 + $0x7ac] ss:$16 sps:$4 sm:$0xff]  }
 0x4e3   :  { %v2526_v43 = vadd.f32 %v2525_v14, %v2281_v12  ;;  %v2527_v15 = vpop.f32.mrb[17].mxu1  ;;  %3019 = vmatprep.subr.bf16.mxu1 %v5174_v35  ;;  %v5211_v35 = vld [vmem:[#allocation9 + $0x7a8] ss:$16 sps:$4 sm:$0xff]  }
 0x4e4   :  { %v2528_v17 = vadd.f32 %v2527_v15, %v2285_v13  ;;  %v2529_v19 = vpop.f32.mrb[18].mxu1  ;;  %v4383_v15 = vld [vmem:[#allocation5 + $0xb] ss:$0 sm:$0xff] }
 0x4e5   :  { %vm2535_vm9 = vcmp.ge.f32.partialorder %v2526_v43, 0.0  ;;  %v2540_v20 = vmul.f32 %v2537_v58, %v2526_v43  ;;  %v2530_v0 = vpop.f32.mrb[19].mxu1 }
 0x4e6   :  { %vm2536_vm10 = vcmp.ge.f32.partialorder %v2528_v17, 0.0  ;;  %v2541_v21 = vmul.f32 %v2537_v58, %v2528_v17  ;;  %3020 = vmatpush1.bf16.msra.mxu1 %v5172_v36  ;;  %v5226_v58 = vld [vmem:[#allocation9 + $0x800] ss:$16 sps:$4 sm:$0xff]   ;;  %v5219_v36 = vld [vmem:[#allocation9 + $0x7cc] ss:$16 sps:$4 sm:$0xff]  }
 0x4e7   :  { %v2544_v22 = vsel %vm2535_vm9, %v2526_v43, %v2540_v20  ;;  %3021 = vmatprep.subr.bf16.mxu1 %v5177_v16  ;;  %v5217_v16 = vld [vmem:[#allocation9 + $0x7c8] ss:$16 sps:$4 sm:$0xff]  }
 0x4e8   :  { %v2545_v23 = vsel %vm2536_vm10, %v2528_v17, %v2541_v21  ;;  %v2548_v7 = vpack.c.bf16 %v2544_v22, %v2544_v22  ;;  %v2895_v22 = vstv %s4416_s13 }
 0x4e9   :  { %v2549_v25 = vpack.c.bf16 %v2545_v23, %v2545_v23 }
 0x4ea   :  { %3022 = vmatpush1.bf16.msra.mxu1 %v5175_v3  ;;  %v5225_v3 = vld [vmem:[#allocation9 + $0x7ec] ss:$16 sps:$4 sm:$0xff]  }
 0x4eb   :  { %2885 = vmatprep.mubr.bf16.mxu0 %v2549_v25  ;;  %3505 = vmatprep.subr.bf16.mxu1 %v5183_v39  ;;  %v5229_v39 = vld [vmem:[#allocation9 + $0x808] ss:$16 sps:$4 sm:$0xff]  }
 0x4ec   :  { %2886 = vmatmul.mubr.bf16.vlgmr.msra.gmra.mrb[8].mxu0 %v2548_v7 }
 0x4ed   :  { %3465 = vmatpush1.bf16.msra.mxu0 %v5178_v37  ;;  %v5223_v37 = vld [vmem:[#allocation9 + $0x7e8] ss:$16 sps:$4 sm:$0xff]  }
 0x4ee   :  { %3466 = vmatprep.subr.bf16.mxu0 %v5186_v40  ;;  %v5237_v40 = vld [vmem:[#allocation9 + $0x82c] ss:$16 sps:$4 sm:$0xff]  }
 0x4f1   :  { %3467 = vmatpush1.bf16.msra.mxu0 %v5184_v41  ;;  %v5235_v41 = vld [vmem:[#allocation9 + $0x828] ss:$16 sps:$4 sm:$0xff]  }
 0x4f2   :  { %3468 = vmatprep.subr.bf16.mxu0 %v5192_v42  ;;  %v5243_v42 = vld [vmem:[#allocation9 + $0x84c] ss:$16 sps:$4 sm:$0xff]  }
 0x4f5   :  { %3469 = vmatpush1.bf16.msra.mxu0 %v5190_v44  ;;  %v5241_v44 = vld [vmem:[#allocation9 + $0x848] ss:$16 sps:$4 sm:$0xff]  }
 0x4f6   :  { %3470 = vmatprep.subr.bf16.mxu0 %v5198_v45  ;;  %v5249_v45 = vld [vmem:[#allocation9 + $0x86c] ss:$16 sps:$4 sm:$0xff]  }
 0x4f9   :  { %3471 = vmatpush1.bf16.msra.mxu0 %v5196_v46  ;;  %v5247_v46 = vld [vmem:[#allocation9 + $0x868] ss:$16 sps:$4 sm:$0xff]  }
 0x4fa   :  { %3472 = vmatprep.subr.bf16.mxu0 %v5204_v47  ;;  %v5255_v47 = vld [vmem:[#allocation9 + $0x88c] ss:$16 sps:$4 sm:$0xff]  }
 0x4fd   :  { %3473 = vmatpush1.bf16.msra.mxu0 %v5202_v48  ;;  %v5253_v48 = vld [vmem:[#allocation9 + $0x888] ss:$16 sps:$4 sm:$0xff]  }
 0x4fe   :  { %3474 = vmatprep.subr.bf16.mxu0 %v5210_v50  ;;  %v5261_v50 = vld [vmem:[#allocation9 + $0x8ac] ss:$16 sps:$4 sm:$0xff]  }
 0x501   :  { %3475 = vmatpush1.bf16.msra.mxu0 %v5208_v51  ;;  %v5259_v51 = vld [vmem:[#allocation9 + $0x8a8] ss:$16 sps:$4 sm:$0xff]  }
 0x502   :  { %3476 = vmatprep.subr.bf16.mxu0 %v5216_v52  ;;  %v5264_v52 = vld [vmem:[#allocation9 + $0x8c4] ss:$16 sps:$4 sm:$0xff]  }
 0x505   :  { %3477 = vmatpush1.bf16.msra.mxu0 %v5214_v53  ;;  %v5267_v53 = vld [vmem:[#allocation9 + $0x8cc] ss:$16 sps:$4 sm:$0xff]  }
 0x506   :  { %3478 = vmatprep.subr.bf16.mxu0 %v5222_v55  ;;  %v5262_v55 = vld [vmem:[#allocation9 + $0x8c0] ss:$16 sps:$4 sm:$0xff]  }
 0x509   :  { %3479 = vmatpush1.bf16.msra.mxu0 %v5220_v56  ;;  %v5265_v56 = vld [vmem:[#allocation9 + $0x8c8] ss:$16 sps:$4 sm:$0xff]  }
 0x50a   :  { %3480 = vmatprep.subr.bf16.mxu0 %v5228_v57  ;;  %v5270_v57 = vld [vmem:[#allocation9 + $0x8e4] ss:$16 sps:$4 sm:$0xff]  }
 0x50d   :  { %3481 = vmatpush1.bf16.msra.mxu0 %v5226_v58  ;;  %v5273_v58 = vld [vmem:[#allocation9 + $0x8ec] ss:$16 sps:$4 sm:$0xff]  }
 0x50e   :  { %3482 = vmatprep.subr.bf16.mxu0 %v5234_v59  ;;  %v5268_v59 = vld [vmem:[#allocation9 + $0x8e0] ss:$16 sps:$4 sm:$0xff]  }
 0x511   :  { %3483 = vmatpush1.bf16.msra.mxu0 %v5232_v60  ;;  %v5271_v60 = vld [vmem:[#allocation9 + $0x8e8] ss:$16 sps:$4 sm:$0xff]  }
 0x512   :  { %3484 = vmatprep.subr.bf16.mxu0 %v5240_v61  ;;  %v5276_v61 = vld [vmem:[#allocation8 + $0x284] ss:$8 sps:$4 sm:$0xff]  }
 0x515   :  { %3485 = vmatpush1.bf16.msra.mxu0 %v5238_v62  ;;  %v2915_v62 = vld [vmem:[#allocation5 + $0xc] sm:$0x3] }
 0x516   :  { %3486 = vmatprep.subr.bf16.mxu0 %v5246_v24  ;;  %v2920_v24 = vrot.slane %v2915_v62, %v5635_v63 }
 0x519   :  { %3487 = vmatpush1.bf16.msra.mxu0 %v5244_v5  ;;  %v2924_v5 = vrot.slane %v2915_v62, %v5640_v1 }
 0x51a   :  { %3488 = vmatprep.subr.bf16.mxu0 %v5252_v6 }
 0x51d   :  { %3489 = vmatpush1.bf16.msra.mxu0 %v5250_v8  ;;  %v3051_v8 = vstv %s4433_s14 }
 0x51e   :  { %3490 = vmatprep.subr.bf16.mxu0 %v5258_v9 }
 0x521   :  { %3491 = vmatpush1.bf16.msra.mxu0 %v5256_v10 }
 0x522   :  { %3492 = vmatprep.subr.bf16.mxu0 %v5264_v52 }
 0x525   :  { %3493 = vmatpush1.bf16.msra.mxu0 %v5262_v55 }
 0x526   :  { %3494 = vmatprep.subr.bf16.mxu0 %v5270_v57 }
 0x529   :  { %3495 = vmatpush1.bf16.msra.mxu0 %v5268_v59 }
 0x52a   :  { %3960 = vmatprep.subr.bf16.mxu0 %v5276_v61 }
 0x59f   :  { %v4602_v11 = vpop.f32.mrb[20].mxu1 }
 0x5a0   :  { %v4603_v12 = vpop.f32.mrb[21].mxu1 }
 0x5a1   :  { %v4604_v13 = vadd.f32 %v4603_v12, %v4602_v11  ;;  %v4605_v14 = vpop.f32.mrb[22].mxu1 }
 0x5a2   :  { %v4606_v43 = vpop.f32.mrb[23].mxu1 }
 0x5a3   :  { %v2848_v20 = vadd.f32 %v4604_v13, %v4383_v15 }
 0x5bf   :  { %v4624_v17 = vpop.f32.mrb[8].mxu0 }
 0x5c0   :  { %v4625_v19 = vpop.f32.mrb[9].mxu0 }
 0x5c1   :  { %v4626_v0 = vadd.f32 %v4625_v19, %v4624_v17  ;;  %v4627_v21 = vpop.f32.mrb[10].mxu0 }
 0x5c2   :  { %v4628_v23 = vpop.f32.mrb[11].mxu0  ;;  %v5279_v21 = vld [vmem:[#allocation8 + $0x294] ss:$8 sps:$4 sm:$0xff]  }
 0x5c3   :  { %v2888_v25 = vadd.f32 %v4626_v0, %v2848_v20  ;;  %v5274_v20 = vld [vmem:[#allocation8 + $0x280] ss:$8 sps:$4 sm:$0xff]   ;;  %v5282_v23 = vld [vmem:[#allocation8 + $0x2a4] ss:$8 sps:$4 sm:$0xff]  }
 0x5c5   :  { %vm2894_vm11 = vcmp.ge.f32.partialorder %v2888_v25, 0.0  ;;  %v2896_v7 = vmul.f32 %v2895_v22, %v2888_v25  ;;  %v5277_v22 = vld [vmem:[#allocation8 + $0x290] ss:$8 sps:$4 sm:$0xff]  }
 0x5c7   :  { %v2897_v54 = vsel %vm2894_vm11, %v2888_v25, %v2896_v7  ;;  %v5280_v25 = vld [vmem:[#allocation8 + $0x2a0] ss:$8 sps:$4 sm:$0xff]   ;;  %v5285_v7 = vld [vmem:[#allocation8 + $0x2b4] ss:$8 sps:$4 sm:$0xff]  }
 0x5c8   :  { %v2898_v27 = vpack.c.bf16 %v2897_v54, %v2897_v54  ;;  %v5283_v54 = vld [vmem:[#allocation8 + $0x2b0] ss:$8 sps:$4 sm:$0xff]  }
 0x5ca   :  { %3040 = vmatmul.mubr.bf16.vlgmr.msra.gmra.mrb[24].mxu1 %v2898_v27  ;;  %v5286_v27 = vld [vmem:[#allocation8 + $0x2c0] ss:$8 sps:$4 sm:$0xff]  }
 0x5cb   :  { %3506 = vmatpush1.bf16.msra.mxu1 %v5181_v26  ;;  %v5288_v26 = vld [vmem:[#allocation8 + $0x2c4] ss:$8 sps:$4 sm:$0xff]  }
 0x5cc   :  { %3507 = vmatprep.subr.bf16.mxu1 %v5189_v28  ;;  %v5291_v28 = vld [vmem:[#allocation8 + $0x2d4] ss:$8 sps:$4 sm:$0xff]  }
 0x5cf   :  { %3508 = vmatpush1.bf16.msra.mxu1 %v5187_v29  ;;  %v5289_v29 = vld [vmem:[#allocation8 + $0x2d0] ss:$8 sps:$4 sm:$0xff]  }
 0x5d0   :  { %3509 = vmatprep.subr.bf16.mxu1 %v5195_v30  ;;  %v5294_v30 = vld [vmem:[#allocation8 + $0x2e4] ss:$8 sps:$4 sm:$0xff]  }
 0x5d3   :  { %3510 = vmatpush1.bf16.msra.mxu1 %v5193_v31  ;;  %v5292_v31 = vld [vmem:[#allocation8 + $0x2e0] ss:$8 sps:$4 sm:$0xff]  }
 0x5d4   :  { %3511 = vmatprep.subr.bf16.mxu1 %v5201_v18  ;;  %v5297_v18 = vld [vmem:[#allocation8 + $0x2f4] ss:$8 sps:$4 sm:$0xff]  }
 0x5d7   :  { %3512 = vmatpush1.bf16.msra.mxu1 %v5199_v32  ;;  %v5295_v32 = vld [vmem:[#allocation8 + $0x2f0] ss:$8 sps:$4 sm:$0xff]  }
 0x5d8   :  { %3513 = vmatprep.subr.bf16.mxu1 %v5207_v49  ;;  %v5300_v49 = vld [vmem:[#allocation8 + $0x304] ss:$8 sps:$4 sm:$0xff]  }
 0x5db   :  { %3514 = vmatpush1.bf16.msra.mxu1 %v5205_v33  ;;  %v5298_v33 = vld [vmem:[#allocation8 + $0x300] ss:$8 sps:$4 sm:$0xff]  }
 0x5dc   :  { %3515 = vmatprep.subr.bf16.mxu1 %v5213_v34  ;;  %v5303_v34 = vld [vmem:[#allocation8 + $0x314] ss:$8 sps:$4 sm:$0xff]  }
 0x5df   :  { %3516 = vmatpush1.bf16.msra.mxu1 %v5211_v35  ;;  %v5301_v35 = vld [vmem:[#allocation8 + $0x310] ss:$8 sps:$4 sm:$0xff]  }
 0x5e0   :  { %3517 = vmatprep.subr.bf16.mxu1 %v5219_v36  ;;  %v5306_v36 = vld [vmem:[#allocation8 + $0x324] ss:$8 sps:$4 sm:$0xff]  }
 0x5e3   :  { %3518 = vmatpush1.bf16.msra.mxu1 %v5217_v16  ;;  %v5304_v16 = vld [vmem:[#allocation8 + $0x320] ss:$8 sps:$4 sm:$0xff]  }
 0x5e4   :  { %3519 = vmatprep.subr.bf16.mxu1 %v5225_v3  ;;  %v5309_v3 = vld [vmem:[#allocation8 + $0x334] ss:$8 sps:$4 sm:$0xff]  }
 0x5e7   :  { %3520 = vmatpush1.bf16.msra.mxu1 %v5223_v37  ;;  %v5307_v37 = vld [vmem:[#allocation8 + $0x330] ss:$8 sps:$4 sm:$0xff]  }
 0x5e8   :  { %3521 = vmatprep.subr.bf16.mxu1 %v5231_v38  ;;  %v5312_v38 = vld [vmem:[#allocation8 + $0x344] ss:$8 sps:$4 sm:$0xff]  }
 0x5eb   :  { %3522 = vmatpush1.bf16.msra.mxu1 %v5229_v39  ;;  %v5310_v39 = vld [vmem:[#allocation8 + $0x340] ss:$8 sps:$4 sm:$0xff]  }
 0x5ec   :  { %3523 = vmatprep.subr.bf16.mxu1 %v5237_v40  ;;  %v5315_v40 = vld [vmem:[#allocation8 + $0x354] ss:$8 sps:$4 sm:$0xff]  }
 0x5ef   :  { %3524 = vmatpush1.bf16.msra.mxu1 %v5235_v41  ;;  %v5313_v41 = vld [vmem:[#allocation8 + $0x350] ss:$8 sps:$4 sm:$0xff]  }
 0x5f0   :  { %3525 = vmatprep.subr.bf16.mxu1 %v5243_v42  ;;  %v5318_v42 = vld [vmem:[#allocation8 + $0x364] ss:$8 sps:$4 sm:$0xff]  }
 0x5f3   :  { %3526 = vmatpush1.bf16.msra.mxu1 %v5241_v44  ;;  %v5316_v44 = vld [vmem:[#allocation8 + $0x360] ss:$8 sps:$4 sm:$0xff]  }
 0x5f4   :  { %3527 = vmatprep.subr.bf16.mxu1 %v5249_v45  ;;  %v5321_v45 = vld [vmem:[#allocation8 + $0x374] ss:$8 sps:$4 sm:$0xff]  }
 0x5f7   :  { %3528 = vmatpush1.bf16.msra.mxu1 %v5247_v46  ;;  %v5319_v46 = vld [vmem:[#allocation8 + $0x370] ss:$8 sps:$4 sm:$0xff]  }
 0x5f8   :  { %3529 = vmatprep.subr.bf16.mxu1 %v5255_v47  ;;  %v5324_v47 = vld [vmem:[#allocation8 + $0x384] ss:$8 sps:$4 sm:$0xff]  }
 0x5fb   :  { %3530 = vmatpush1.bf16.msra.mxu1 %v5253_v48  ;;  %v3122_v48 = vld [vmem:[#allocation5 + $0xe] sm:$0xf] }
 0x5fc   :  { %3531 = vmatprep.subr.bf16.mxu1 %v5261_v50  ;;  %v3127_v50 = vrot.slane %v3122_v48, %v5635_v63  ;;  %v3131_v52 = vrot.slane %v3122_v48, %v5640_v1 }
 0x5ff   :  { %3532 = vmatpush1.bf16.msra.mxu1 %v5259_v51  ;;  %v3135_v51 = vrot.slane %v3122_v48, %v5651_v2 }
 0x600   :  { %3533 = vmatprep.subr.bf16.mxu1 %v5267_v53  ;;  %v3139_v53 = vrot.slane %v3122_v48, %v5654_v4 }
 0x603   :  { %3534 = vmatpush1.bf16.msra.mxu1 %v5265_v56  ;;  %v3551_v56 = vstv %s4498_s15 }
 0x604   :  { %3535 = vmatprep.subr.bf16.mxu1 %v5273_v58 }
 0x607   :  { %3536 = vmatpush1.bf16.msra.mxu1 %v5271_v60 }
 0x69d   :  { %v3041_v6 = vpop.f32.mrb[24].mxu1 }
 0x69e   :  { %v3042_v9 = vadd.f32 %v3041_v6, %v2920_v24  ;;  %v3043_v10 = vpop.f32.mrb[25].mxu1 }
 0x69f   :  { %v3044_v11 = vadd.f32 %v3043_v10, %v2924_v5  ;;  %v3045_v12 = vpop.f32.mrb[26].mxu1 }
 0x6a0   :  { %vm3049_vm12 = vcmp.ge.f32.partialorder %v3042_v9, 0.0  ;;  %v3052_v13 = vmul.f32 %v3051_v8, %v3042_v9  ;;  %v3046_v14 = vpop.f32.mrb[27].mxu1 }
 0x6a1   :  { %vm3050_vm13 = vcmp.ge.f32.partialorder %v3044_v11, 0.0  ;;  %v3053_v43 = vmul.f32 %v3051_v8, %v3044_v11 }
 0x6a2   :  { %v3054_v15 = vsel %vm3049_vm12, %v3042_v9, %v3052_v13 }
 0x6a3   :  { %v3055_v17 = vsel %vm3050_vm13, %v3044_v11, %v3053_v43  ;;  %v3056_v0 = vpack.c.bf16 %v3054_v15, %v3054_v15 }
 0x6a4   :  { %v3057_v19 = vpack.c.bf16 %v3055_v17, %v3055_v17  ;;  %v5322_v17 = vld [vmem:[#allocation8 + $0x380] ss:$8 sps:$4 sm:$0xff]  }
 0x6a6   :  { %3496 = vmatprep.mubr.bf16.mxu0 %v3057_v19  ;;  %3537 = vmatprep.mubr.bf16.mxu1 %v3057_v19 }
 0x6a7   :  { %3497 = vmatmul.mubr.bf16.vlgmr.msra.gmra.mrb[12].mxu0 %v3056_v0  ;;  %3538 = vmatmul.mubr.bf16.vlgmr.msra.gmra.mrb[28].mxu1 %v3056_v0 }
 0x6a8   :  { %3961 = vmatpush1.bf16.msra.mxu0 %v5274_v20  ;;  %v5327_v20 = vld [vmem:[#allocation8 + $0x394] ss:$8 sps:$4 sm:$0xff]  }
 0x6a9   :  { %3962 = vmatprep.subr.bf16.mxu0 %v5279_v21  ;;  %v5325_v21 = vld [vmem:[#allocation8 + $0x390] ss:$8 sps:$4 sm:$0xff]  }
 0x6ac   :  { %3963 = vmatpush1.bf16.msra.mxu0 %v5277_v22  ;;  %v5330_v22 = vld [vmem:[#allocation8 + $0x3a4] ss:$8 sps:$4 sm:$0xff]  }
 0x6ad   :  { %3964 = vmatprep.subr.bf16.mxu0 %v5282_v23  ;;  %v5328_v23 = vld [vmem:[#allocation8 + $0x3a0] ss:$8 sps:$4 sm:$0xff]  }
 0x6b0   :  { %3965 = vmatpush1.bf16.msra.mxu0 %v5280_v25  ;;  %v5333_v25 = vld [vmem:[#allocation8 + $0x3b4] ss:$8 sps:$4 sm:$0xff]  }
 0x6b1   :  { %3966 = vmatprep.subr.bf16.mxu0 %v5285_v7  ;;  %v5331_v7 = vld [vmem:[#allocation8 + $0x3b0] ss:$8 sps:$4 sm:$0xff]  }
 0x6b4   :  { %3967 = vmatpush1.bf16.msra.mxu0 %v5283_v54  ;;  %v5336_v54 = vld [vmem:[#allocation8 + $0x3c4] ss:$8 sps:$4 sm:$0xff]  }
 0x6b5   :  { %3968 = vmatprep.subr.bf16.mxu0 %v5288_v26  ;;  %v5334_v26 = vld [vmem:[#allocation8 + $0x3c0] ss:$8 sps:$4 sm:$0xff]  }
 0x6b8   :  { %3969 = vmatpush1.bf16.msra.mxu0 %v5286_v27  ;;  %v5339_v27 = vld [vmem:[#allocation8 + $0x3d4] ss:$8 sps:$4 sm:$0xff]  }
 0x6b9   :  { %3970 = vmatprep.subr.bf16.mxu0 %v5291_v28  ;;  %v5337_v28 = vld [vmem:[#allocation8 + $0x3d0] ss:$8 sps:$4 sm:$0xff]  }
 0x6bc   :  { %3971 = vmatpush1.bf16.msra.mxu0 %v5289_v29  ;;  %v5342_v29 = vld [vmem:[#allocation8 + $0x3e4] ss:$8 sps:$4 sm:$0xff]  }
 0x6bd   :  { %3972 = vmatprep.subr.bf16.mxu0 %v5294_v30  ;;  %v5340_v30 = vld [vmem:[#allocation8 + $0x3e0] ss:$8 sps:$4 sm:$0xff]  }
 0x6c0   :  { %3973 = vmatpush1.bf16.msra.mxu0 %v5292_v31  ;;  %v5345_v31 = vld [vmem:[#allocation8 + $0x3f4] ss:$8 sps:$4 sm:$0xff]  }
 0x6c1   :  { %3974 = vmatprep.subr.bf16.mxu0 %v5297_v18  ;;  %v5343_v18 = vld [vmem:[#allocation8 + $0x3f0] ss:$8 sps:$4 sm:$0xff]  }
 0x6c4   :  { %3975 = vmatpush1.bf16.msra.mxu0 %v5295_v32  ;;  %v5348_v32 = vld [vmem:[#allocation8 + $0x404] ss:$8 sps:$4 sm:$0xff]  }
 0x6c5   :  { %3976 = vmatprep.subr.bf16.mxu0 %v5300_v49  ;;  %v5346_v49 = vld [vmem:[#allocation8 + $0x400] ss:$8 sps:$4 sm:$0xff]  }
 0x6c8   :  { %3977 = vmatpush1.bf16.msra.mxu0 %v5298_v33  ;;  %v5351_v33 = vld [vmem:[#allocation8 + $0x414] ss:$8 sps:$4 sm:$0xff]  }
 0x6c9   :  { %3978 = vmatprep.subr.bf16.mxu0 %v5303_v34  ;;  %v5349_v34 = vld [vmem:[#allocation8 + $0x410] ss:$8 sps:$4 sm:$0xff]  }
 0x6cc   :  { %3979 = vmatpush1.bf16.msra.mxu0 %v5301_v35  ;;  %v5354_v35 = vld [vmem:[#allocation8 + $0x424] ss:$8 sps:$4 sm:$0xff]  }
 0x6cd   :  { %3980 = vmatprep.subr.bf16.mxu0 %v5306_v36  ;;  %v5352_v36 = vld [vmem:[#allocation8 + $0x420] ss:$8 sps:$4 sm:$0xff]  }
 0x6d0   :  { %3981 = vmatpush1.bf16.msra.mxu0 %v5304_v16  ;;  %v5357_v16 = vld [vmem:[#allocation8 + $0x434] ss:$8 sps:$4 sm:$0xff]  }
 0x6d1   :  { %3982 = vmatprep.subr.bf16.mxu0 %v5309_v3  ;;  %v5355_v3 = vld [vmem:[#allocation8 + $0x430] ss:$8 sps:$4 sm:$0xff]  }
 0x6d4   :  { %3983 = vmatpush1.bf16.msra.mxu0 %v5307_v37  ;;  %v5360_v37 = vld [vmem:[#allocation8 + $0x444] ss:$8 sps:$4 sm:$0xff]  }
 0x6d5   :  { %3984 = vmatprep.subr.bf16.mxu0 %v5312_v38  ;;  %v5358_v38 = vld [vmem:[#allocation8 + $0x440] ss:$8 sps:$4 sm:$0xff]  }
 0x6d8   :  { %3985 = vmatpush1.bf16.msra.mxu0 %v5310_v39  ;;  %v5363_v39 = vld [vmem:[#allocation8 + $0x454] ss:$8 sps:$4 sm:$0xff]  }
 0x6d9   :  { %3986 = vmatprep.subr.bf16.mxu0 %v5315_v40  ;;  %v5361_v40 = vld [vmem:[#allocation8 + $0x450] ss:$8 sps:$4 sm:$0xff]  }
 0x6dc   :  { %3987 = vmatpush1.bf16.msra.mxu0 %v5313_v41  ;;  %v5366_v41 = vld [vmem:[#allocation8 + $0x464] ss:$8 sps:$4 sm:$0xff]  }
 0x6dd   :  { %3988 = vmatprep.subr.bf16.mxu0 %v5318_v42  ;;  %v5364_v42 = vld [vmem:[#allocation8 + $0x460] ss:$8 sps:$4 sm:$0xff]  }
 0x6e0   :  { %3989 = vmatpush1.bf16.msra.mxu0 %v5316_v44  ;;  %v5369_v44 = vld [vmem:[#allocation8 + $0x474] ss:$8 sps:$4 sm:$0xff]  }
 0x6e1   :  { %3990 = vmatprep.subr.bf16.mxu0 %v5321_v45  ;;  %v5367_v45 = vld [vmem:[#allocation8 + $0x470] ss:$8 sps:$4 sm:$0xff]  }
 0x6e4   :  { %3991 = vmatpush1.bf16.msra.mxu0 %v5319_v46 }
 0x6e5   :  { %4001 = vmatprep.subr.bf16.mxu0 %v5324_v47  ;;  %v3628_v47 = vld [vmem:[#allocation5 + $0x12] sm:$0x3] }
 0x6e6   :  { %v3633_v48 = vrot.slane %v3628_v47, %v5635_v63 }
 0x77a   :  { %v3498_v55 = vpop.f32.mrb[12].mxu0  ;;  %v3539_v57 = vpop.f32.mrb[28].mxu1 }
 0x77b   :  { %v3499_v58 = vadd.f32 %v3498_v55, %v3127_v50  ;;  %v3540_v59 = vadd.f32 %v3539_v57, %v3135_v51  ;;  %v3500_v60 = vpop.f32.mrb[13].mxu0  ;;  %v3541_v61 = vpop.f32.mrb[29].mxu1  ;;  %v3637_v50 = vrot.slane %v3628_v47, %v5640_v1 }
 0x77c   :  { %v3501_v62 = vadd.f32 %v3500_v60, %v3131_v52  ;;  %v3542_v24 = vadd.f32 %v3541_v61, %v3139_v53  ;;  %v3502_v5 = vpop.f32.mrb[14].mxu0  ;;  %v3543_v6 = vpop.f32.mrb[30].mxu1 }
 0x77d   :  { %vm3547_vm14 = vcmp.ge.f32.partialorder %v3499_v58, 0.0  ;;  %v3552_v8 = vmul.f32 %v3551_v56, %v3499_v58  ;;  %vm3549_vm15 = vcmp.ge.f32.partialorder %v3540_v59, 0.0  ;;  %v3554_v9 = vmul.f32 %v3551_v56, %v3540_v59  ;;  %v3503_v2 = vpop.f32.mrb[15].mxu0  ;;  %v3544_v10 = vpop.f32.mrb[31].mxu1 }
 0x77e   :  { %vm3548_vm0 = vcmp.ge.f32.partialorder %v3501_v62, 0.0  ;;  %v3553_v11 = vmul.f32 %v3551_v56, %v3501_v62  ;;  %vm3550_vm1 = vcmp.ge.f32.partialorder %v3542_v24, 0.0  ;;  %v3555_v4 = vmul.f32 %v3551_v56, %v3542_v24 }
 0x77f   :  { %v3556_v12 = vsel %vm3547_vm14, %v3499_v58, %v3552_v8  ;;  %v5677_v13 = vsel %vm3549_vm15, %v3540_v59, %v3554_v9 }
 0x780   :  { %v3557_v14 = vsel %vm3548_vm0, %v3501_v62, %v3553_v11  ;;  %v3559_v43 = vsel %vm3550_vm1, %v3542_v24, %v3555_v4  ;;  %v3560_v19 = vpack.c.bf16 %v3556_v12, %v3556_v12  ;;  %v3562_v46 = vpack.c.bf16 %v5677_v13, %v5677_v13 }
 0x781   :  { %v3561_v15 = vpack.c.bf16 %v3557_v14, %v3557_v14  ;;  %v3563_v0 = vpack.c.bf16 %v3559_v43, %v3559_v43 }
 0x783   :  { %3992 = vmatprep.mubr.bf16.mxu0 %v3561_v15 }
 0x784   :  { %3993 = vmatmul.mubr.bf16.vlgmr.msra.gmra.mrb[16].mxu0 %v3560_v19 }
 0x785   :  { %4002 = vmatpush1.bf16.msra.mxu0 %v5322_v17  ;;  %4033 = vmatprep.mubr.bf16.mxu0 %v3563_v0 }
 0x786   :  { %4003 = vmatprep.subr.bf16.mxu0 %v5327_v20 }
 0x789   :  { %4004 = vmatpush1.bf16.msra.mxu0 %v5325_v21 }
 0x78a   :  { %4005 = vmatprep.subr.bf16.mxu0 %v5330_v22 }
 0x78d   :  { %4006 = vmatpush1.bf16.msra.mxu0 %v5328_v23 }
 0x78e   :  { %4007 = vmatprep.subr.bf16.mxu0 %v5333_v25 }
 0x791   :  { %4008 = vmatpush1.bf16.msra.mxu0 %v5331_v7 }
 0x792   :  { %4009 = vmatprep.subr.bf16.mxu0 %v5336_v54 }
 0x795   :  { %4010 = vmatpush1.bf16.msra.mxu0 %v5334_v26 }
 0x796   :  { %4011 = vmatprep.subr.bf16.mxu0 %v5339_v27 }
 0x799   :  { %4012 = vmatpush1.bf16.msra.mxu0 %v5337_v28 }
 0x79a   :  { %4013 = vmatprep.subr.bf16.mxu0 %v5342_v29 }
 0x79d   :  { %4014 = vmatpush1.bf16.msra.mxu0 %v5340_v30 }
 0x79e   :  { %4015 = vmatprep.subr.bf16.mxu0 %v5345_v31 }
 0x7a1   :  { %4016 = vmatpush1.bf16.msra.mxu0 %v5343_v18 }
 0x7a2   :  { %4017 = vmatprep.subr.bf16.mxu0 %v5348_v32 }
 0x7a5   :  { %4018 = vmatpush1.bf16.msra.mxu0 %v5346_v49 }
 0x7a6   :  { %4019 = vmatprep.subr.bf16.mxu0 %v5351_v33 }
 0x7a9   :  { %4020 = vmatpush1.bf16.msra.mxu0 %v5349_v34 }
 0x7aa   :  { %4021 = vmatprep.subr.bf16.mxu0 %v5354_v35 }
 0x7ad   :  { %4022 = vmatpush1.bf16.msra.mxu0 %v5352_v36 }
 0x7ae   :  { %4023 = vmatprep.subr.bf16.mxu0 %v5357_v16 }
 0x7b1   :  { %4024 = vmatpush1.bf16.msra.mxu0 %v5355_v3 }
 0x7b2   :  { %4025 = vmatprep.subr.bf16.mxu0 %v5360_v37 }
 0x7b5   :  { %4026 = vmatpush1.bf16.msra.mxu0 %v5358_v38 }
 0x7b6   :  { %4027 = vmatprep.subr.bf16.mxu0 %v5363_v39 }
 0x7b9   :  { %4028 = vmatpush1.bf16.msra.mxu0 %v5361_v40 }
 0x7ba   :  { %4029 = vmatprep.subr.bf16.mxu0 %v5366_v41 }
 0x7bd   :  { %4030 = vmatpush1.bf16.msra.mxu0 %v5364_v42 }
 0x7be   :  { %4031 = vmatprep.subr.bf16.mxu0 %v5369_v44 }
 0x7c1   :  { %4032 = vmatpush1.bf16.msra.mxu0 %v5367_v45 }
 0x7c4   :  { %4034 = vmatmul.mubr.bf16.vlgmr.msra.gmra.mrb[16].mxu0 %v3562_v46 }
 0x897   :  { %v4035_v51 = vpop.f32.mrb[16].mxu0 }
 0x898   :  { %v4638_v52 = vadd.f32 %v4035_v51, %v3633_v48  ;;  %v4037_v53 = vpop.f32.mrb[17].mxu0 }
 0x899   :  { %v4639_v55 = vadd.f32 %v4037_v53, %v3637_v50  ;;  %v4039_v56 = vpop.f32.mrb[18].mxu0 }
 0x89a   :  { %v4042_v57 = vsub.f32 0.0, %v4638_v52  ;;  %v4040_v58 = vpop.f32.mrb[19].mxu0 }
 0x89b   :  { %v4043_v59 = vsub.f32 0.0, %v4639_v55 }
 0x89c   :  { %v4044_v60 = vmul.f32 1.442695, %v4042_v57 }
 0x89d   :  { %v4046_v61 = vmul.f32 1.442695, %v4043_v59 }
 0x89e   :  { %5370 = vpow2.f32 %v4044_v60 }
 0x89f   :  { %5372 = vpow2.f32 %v4046_v61 }
 0x8a8   :  { %v5371_v62 = vpop.eup %5370 }
 0x8a9   :  { %v5373_v24 = vpop.eup %5372  ;;  %v4048_v5 = vadd.f32 1.0, %v5371_v62 }
 0x8aa   :  { %v4049_v6 = vadd.f32 1.0, %v5373_v24 }
 0x8ab   :  { %5374 = vrcp.f32 %v4048_v5 }
 0x8ac   :  { %5376 = vrcp.f32 %v4049_v6 }
 0x8b5   :  { %v5375_v63 = vpop.eup %5374 }
 0x8b6   :  { %v5377_v1 = vpop.eup %5376 }
 0x8b7   :  { %v4056_v8 = vcombine.low %v5375_v63, %v5377_v1 }
 0x8b9   :  { %4563 = vst.sshfl [vmem:[%s5692_s6] sm:$0x33 pattern:$0x76325410] %v4056_v8 }
 0x8ba   :  { %4070 = vsyncpa [#allocation3], 1 }
 0x8bb   :  { %4071 = vsyncpa [#allocation7], 1 }
 0x8bc   :  { %4072 = vsyncpa [#allocation10], 1 }
 0x8bd   :  { %4073 = vsyncpa [#allocation4], 1 }

</bundles_post_ra>
